<compile_context>
chip_gen: v7x
topology: tpu7x:2x2x1
jax: 0.10.0
libtpu: 0.0.40
codegen_flags: <defaults>
</compile_context>

<pallas_src>
import math

import jax
import jax.numpy as jnp
from jax.experimental import pallas as pl
from jax.experimental.pallas import tpu as pltpu


# ------------------------------------------------------------------ fused decoder kernel
def _make_decoder_kernel(L, T, B, H2, S, Din):
    """Returns the fused kernel body (closure over static problem sizes)."""

    def kernel(x_ref, h0_ref, c0_ref, enc_ref,
               wq_ref, bq_ref, wk_ref, bk_ref, v_ref,
               wctx_ref, wqh_ref, bh_ref,
               *rest):
        # rest = [wih_0, whh_0, b_0, ..., wih_{L-1}, whh_{L-1}, b_{L-1},
        #         out_ref, hN_ref, cN_ref]
        lstm_refs = rest[:3 * L]
        out_ref, hN_ref, cN_ref = rest[3 * L:]

        bf16 = jnp.bfloat16
        f32 = jnp.float32

        x = x_ref[...]                                 # (T, B, Din), f32
        enc = enc_ref[...]                             # (B, S, H2), f32

        # Hoist all LSTM weight loads once (bf16 weights, f32 combined bias).
        wih_l = [lstm_refs[3 * l][...] for l in range(L)]
        whh_l = [lstm_refs[3 * l + 1][...] for l in range(L)]
        b_l = [lstm_refs[3 * l + 2][...] for l in range(L)]

        # ---------------- layer-0 input projection hoisted (x is fully available) --------
        gx0 = (jnp.dot(x.reshape(T * B, Din).astype(bf16), wih_l[0],
                       preferred_element_type=f32)
               + b_l[0]).reshape(T, B, 4 * H2)

        # ---------------- layer/time wavefront recurrence (statically unrolled) ----------
        hs = [h0_ref[l] for l in range(L)]             # (B, H2) f32 per layer
        cs = [c0_ref[l] for l in range(L)]

        def cell_step(gates, c_prev):
            # One sigmoid + one tanh over the whole 4*H2 gates (2 EUP pushes, not 4),
            # then take the four H2-lane slices.  PyTorch gate order: i, f, g, o.
            sg = jax.nn.sigmoid(gates)
            tg = jnp.tanh(gates)
            i_g = sg[:, 0 * H2:1 * H2]
            f_g = sg[:, 1 * H2:2 * H2]
            g_g = tg[:, 2 * H2:3 * H2]
            o_g = sg[:, 3 * H2:4 * H2]
            c_new = f_g * c_prev + i_g * g_g
            h_new = o_g * jnp.tanh(c_new)
            return h_new, c_new

        for t in range(T):                             # unrolled: T is tiny
            inp = None
            for l in range(L):
                if l == 0:
                    gates = gx0[t] + jnp.dot(hs[0].astype(bf16), whh_l[0],
                                             preferred_element_type=f32)
                else:
                    # Per-timestep input projection: layer l step t depends only on layer
                    # l-1 step t -> wavefront scheduling across layers/time.
                    gates = (jnp.dot(inp.astype(bf16), wih_l[l],
                                     preferred_element_type=f32)
                             + jnp.dot(hs[l].astype(bf16), whh_l[l],
                                       preferred_element_type=f32)
                             + b_l[l])
                h_new, c_new = cell_step(gates, cs[l])
                hs[l] = h_new
                cs[l] = c_new
                inp = h_new

        for l in range(L):
            hN_ref[l] = hs[l]
            cN_ref[l] = cs[l]

        # ---------------- batched MLP (Bahdanau additive) attention ----------------------
        q3 = jnp.stack(hs, axis=1)                     # (B, L, H2) == hidden.transpose(0,1)
        q2 = q3.reshape(B * L, H2)
        qp = (jnp.dot(q2.astype(bf16), wq_ref[...], preferred_element_type=f32)
              + bq_ref[...])                           # (B*L, H2)
        kp = (jnp.dot(enc.reshape(B * S, H2).astype(bf16), wk_ref[...],
                      preferred_element_type=f32)
              + bk_ref[...])                           # (B*S, H2)
        energy = jnp.tanh(qp.reshape(B, L, 1, H2) + kp.reshape(B, 1, S, H2))  # (B,L,S,H2)
        scores = jnp.sum(energy * v_ref[...], axis=-1)                        # (B, L, S)
        # No max-subtraction: |score| <= sum|v| <= 4 with this init, exp is safe in f32.
        e = jnp.exp(scores)
        w = e * pl.reciprocal(jnp.sum(e, axis=-1, keepdims=True), approx=True)
        ctx = jnp.einsum('bls,bsh->blh', w.astype(bf16), enc.astype(bf16),
                         preferred_element_type=f32)                          # (B, L, H2)

        # ---------------- fused affine head (linear∘fc_out precomposed, no concat) -------
        out_ref[...] = (jnp.dot(ctx.reshape(B * L, H2).astype(bf16), wctx_ref[...],
                                preferred_element_type=f32)
                        + jnp.dot(q2.astype(bf16), wqh_ref[...],
                                  preferred_element_type=f32)
                        + bh_ref[...])                 # (B*L, OUT_PAD), lane-dense store

    return kernel


# -------------------------------------------------------------------------------- module
def _uniform(key, shape, bound):
    return jax.random.uniform(key, shape, jnp.float32, -bound, bound)


class DecoderPallas:
    def __init__(self, input_dim, hidden_dim, output_dim, num_layers, key):
        H2 = hidden_dim * 2
        self.H2 = H2
        self.num_layers = num_layers
        self.output_dim = output_dim
        self.out_pad = ((output_dim + 127) // 128) * 128   # lane-dense fc_out width
        bf16 = jnp.bfloat16
        hi = jax.lax.Precision.HIGHEST
        k = 1.0 / math.sqrt(H2)
        keys = list(jax.random.split(key, 4 * num_layers + 10))
        ki = iter(keys)

        # ----- LSTM parameters (per layer), pre-transposed, biases combined -----
        self.lstm_params = []            # f32 masters (for the pure-JAX reference)
        self.lstm_kernel_params = []     # bf16 weights + f32 bias (for the kernel)
        in_dim = input_dim
        for _ in range(num_layers):
            wih = _uniform(next(ki), (4 * H2, in_dim), k)
            whh = _uniform(next(ki), (4 * H2, H2), k)
            bih = _uniform(next(ki), (4 * H2,), k)
            bhh = _uniform(next(ki), (4 * H2,), k)
            self.lstm_params.append((wih.T, whh.T, (bih + bhh)[None, :]))
            self.lstm_kernel_params.append(
                (wih.T.astype(bf16), whh.T.astype(bf16), (bih + bhh)[None, :]))
            in_dim = H2

        # ----- MLP (Bahdanau additive) attention; scalar score bias omitted (exact) -----
        wq = _uniform(next(ki), (H2, H2), k); bq = _uniform(next(ki), (H2,), k)
        wk = _uniform(next(ki), (H2, H2), k); bk = _uniform(next(ki), (H2,), k)
        v = _uniform(next(ki), (1, H2), k)
        self.attn_params = (wq.T, bq[None, :], wk.T, bk[None, :], v)
        self.attn_kernel_params = (wq.T.astype(bf16), bq[None, :],
                                   wk.T.astype(bf16), bk[None, :], v)

        # ----- head: linear (2*H2 -> H2) then fc_out (H2 -> output_dim) -----
        kb1 = 1.0 / math.sqrt(2 * H2)
        w1 = _uniform(next(ki), (H2, 2 * H2), kb1)
        b1 = _uniform(next(ki), (H2,), kb1)
        w2 = _uniform(next(ki), (output_dim, H2), k)
        b2 = _uniform(next(ki), (output_dim,), k)
        self.head_params = (w1.T, b1[None, :], w2.T, b2[None, :])   # f32 reference form
        # Fused affine head (exact: no nonlinearity between linear and fc_out), zero-padded
        # to a 128-lane-dense output and split into the ctx half and the q half of cat.
        w2p = jnp.zeros((H2, self.out_pad), jnp.float32).at[:, :output_dim].set(w2.T)
        b2p = jnp.zeros((1, self.out_pad), jnp.float32).at[:, :output_dim].set(b2[None, :])
        w_head = jnp.dot(w1.T, w2p, precision=hi)                    # (2*H2, OUT_PAD)
        b_head = jnp.dot(b1[None, :], w2p, precision=hi) + b2p       # (1, OUT_PAD)
        self.head_kernel_params = (w_head[:H2].astype(bf16),         # multiplies ctx
                                   w_head[H2:].astype(bf16),         # multiplies q
                                   b_head)

    def __call__(self, x, hidden, cell, outputs_encoder):
        B, T, Din = x.shape
        L, H2 = self.num_layers, self.H2
        S = outputs_encoder.shape[1]
        OUT = self.output_dim

        x_tm = jnp.transpose(x, (1, 0, 2))             # (T, B, Din), time-major
        lstm_flat = [w for layer in self.lstm_kernel_params for w in layer]

        kernel = _make_decoder_kernel(L, T, B, H2, S, Din)
        out_pad2d, h_new, c_new = pl.pallas_call(
            kernel,
            out_shape=(jax.ShapeDtypeStruct((B * L, self.out_pad), jnp.float32),
                       jax.ShapeDtypeStruct((L, B, H2), jnp.float32),
                       jax.ShapeDtypeStruct((L, B, H2), jnp.float32)),
        )(x_tm, hidden, cell, outputs_encoder,
          *self.attn_kernel_params, *self.head_kernel_params, *lstm_flat)

        output = out_pad2d[:, :OUT].reshape(B, L, OUT)
        return output, (h_new, c_new)


# ---------------------------------------------------------------------- pure-JAX reference
def reference_forward(dec, x, hidden, cell, enc_out):
    B, T, _ = x.shape
    H2 = dec.H2
    hi = jax.lax.Precision.HIGHEST
    layer_in = x
    h_fin, c_fin = [], []
    for l in range(dec.num_layers):
        wih_t, whh_t, b = dec.lstm_params[l]
        hs, cs = hidden[l], cell[l]
        ys = []
        for t in range(T):
            gates = (jnp.dot(layer_in[:, t, :], wih_t, precision=hi)
                     + jnp.dot(hs, whh_t, precision=hi) + b)
            i_g = jax.nn.sigmoid(gates[:, :H2])
            f_g = jax.nn.sigmoid(gates[:, H2:2 * H2])
            g_g = jnp.tanh(gates[:, 2 * H2:3 * H2])
            o_g = jax.nn.sigmoid(gates[:, 3 * H2:])
            cs = f_g * cs + i_g * g_g
            hs = o_g * jnp.tanh(cs)
            ys.append(hs)
        layer_in = jnp.stack(ys, axis=1)
        h_fin.append(hs); c_fin.append(cs)
    hidden_new = jnp.stack(h_fin, 0); cell_new = jnp.stack(c_fin, 0)
    wq_t, bq, wk_t, bk, v = dec.attn_params
    q = jnp.transpose(hidden_new, (1, 0, 2))
    qp = jnp.dot(q, wq_t, precision=hi) + bq
    kp = jnp.dot(enc_out, wk_t, precision=hi) + bk
    energy = jnp.tanh(qp[:, :, None, :] + kp[:, None, :, :])
    scores = jnp.sum(energy * v[None, None, :, :], axis=-1)
    w = jax.nn.softmax(scores, axis=-1)
    ctx = jnp.einsum('bls,bsh->blh', w, enc_out, precision=hi)
    cat = jnp.concatenate([ctx, q], axis=2)
    w1_t, b1, w2_t, b2 = dec.head_params
    out = jnp.dot(jnp.dot(cat, w1_t, precision=hi) + b1, w2_t, precision=hi) + b2
    return out, (hidden_new, cell_new)


if __name__ == "__main__":
    input_dim, hidden_dim, output_dim, num_layers = 16, 16, 12, 2
    B, T, S = 2, 4, 8
    H2 = hidden_dim * 2

    key = jax.random.PRNGKey(0)
    kparam, kx, kh, kc, ke = jax.random.split(key, 5)
    dec = DecoderPallas(input_dim, hidden_dim, output_dim, num_layers, kparam)

    x = jax.random.normal(kx, (B, T, input_dim), jnp.float32)
    hidden = jax.random.normal(kh, (num_layers, B, H2), jnp.float32)
    cell = jax.random.normal(kc, (num_layers, B, H2), jnp.float32)
    outputs_encoder = jax.random.normal(ke, (B, S, H2), jnp.float32)

    out, (h_new, c_new) = dec(x, hidden, cell, outputs_encoder)
    jax.block_until_ready((out, h_new, c_new))

    ref_out, (ref_h, ref_c) = reference_forward(dec, x, hidden, cell, outputs_encoder)
    assert out.shape == (B, num_layers, output_dim)
    assert h_new.shape == (num_layers, B, H2) and c_new.shape == (num_layers, B, H2)
    assert bool(jnp.all(jnp.isfinite(out)))
    assert bool(jnp.allclose(out, ref_out, atol=2e-2, rtol=2e-2))
    assert bool(jnp.allclose(h_new, ref_h, atol=2e-2, rtol=2e-2))
    assert bool(jnp.allclose(c_new, ref_c, atol=2e-2, rtol=2e-2))
    print("KERNEL_OK")
</pallas_src>

<mosaic_0001>
module attributes {stable_mosaic.version = 11 : i64} {
  func.func @kernel(%arg0: memref<4x2x16xf32, #tpu.memory_space<vmem>>, %arg1: memref<2x2x32xf32, #tpu.memory_space<vmem>>, %arg2: memref<2x2x32xf32, #tpu.memory_space<vmem>>, %arg3: memref<2x8x32xf32, #tpu.memory_space<vmem>>, %arg4: memref<32x32xbf16, #tpu.memory_space<vmem>>, %arg5: memref<1x32xf32, #tpu.memory_space<vmem>>, %arg6: memref<32x32xbf16, #tpu.memory_space<vmem>>, %arg7: memref<1x32xf32, #tpu.memory_space<vmem>>, %arg8: memref<1x32xf32, #tpu.memory_space<vmem>>, %arg9: memref<32x128xbf16, #tpu.memory_space<vmem>>, %arg10: memref<32x128xbf16, #tpu.memory_space<vmem>>, %arg11: memref<1x128xf32, #tpu.memory_space<vmem>>, %arg12: memref<16x128xbf16, #tpu.memory_space<vmem>>, %arg13: memref<32x128xbf16, #tpu.memory_space<vmem>>, %arg14: memref<1x128xf32, #tpu.memory_space<vmem>>, %arg15: memref<32x128xbf16, #tpu.memory_space<vmem>>, %arg16: memref<32x128xbf16, #tpu.memory_space<vmem>>, %arg17: memref<1x128xf32, #tpu.memory_space<vmem>>, %arg18: memref<4x128xf32, #tpu.memory_space<vmem>>, %arg19: memref<2x2x32xf32, #tpu.memory_space<vmem>>, %arg20: memref<2x2x32xf32, #tpu.memory_space<vmem>>) attributes {dimension_semantics = [], scalar_prefetch = 0 : i64, scratch_operands = 0 : i64, tpu.core_type = #tpu.core_type<tc>} {
    %c0 = arith.constant 0 : index
    %c0_0 = arith.constant 0 : index
    %c0_1 = arith.constant 0 : index
    %0 = vector.load %arg0[%c0, %c0_0, %c0_1] : memref<4x2x16xf32, #tpu.memory_space<vmem>>, vector<4x2x16xf32>
    %c0_2 = arith.constant 0 : index
    %c0_3 = arith.constant 0 : index
    %c0_4 = arith.constant 0 : index
    %1 = vector.load %arg3[%c0_2, %c0_3, %c0_4] : memref<2x8x32xf32, #tpu.memory_space<vmem>>, vector<2x8x32xf32>
    %c0_5 = arith.constant 0 : index
    %c0_6 = arith.constant 0 : index
    %2 = vector.load %arg12[%c0_5, %c0_6] : memref<16x128xbf16, #tpu.memory_space<vmem>>, vector<16x128xbf16>
    %c0_7 = arith.constant 0 : index
    %c0_8 = arith.constant 0 : index
    %3 = vector.load %arg15[%c0_7, %c0_8] : memref<32x128xbf16, #tpu.memory_space<vmem>>, vector<32x128xbf16>
    %c0_9 = arith.constant 0 : index
    %c0_10 = arith.constant 0 : index
    %4 = vector.load %arg13[%c0_9, %c0_10] : memref<32x128xbf16, #tpu.memory_space<vmem>>, vector<32x128xbf16>
    %c0_11 = arith.constant 0 : index
    %c0_12 = arith.constant 0 : index
    %5 = vector.load %arg16[%c0_11, %c0_12] : memref<32x128xbf16, #tpu.memory_space<vmem>>, vector<32x128xbf16>
    %c0_13 = arith.constant 0 : index
    %c0_14 = arith.constant 0 : index
    %6 = vector.load %arg14[%c0_13, %c0_14] : memref<1x128xf32, #tpu.memory_space<vmem>>, vector<1x128xf32>
    %c0_15 = arith.constant 0 : index
    %c0_16 = arith.constant 0 : index
    %7 = vector.load %arg17[%c0_15, %c0_16] : memref<1x128xf32, #tpu.memory_space<vmem>>, vector<1x128xf32>
    %8 = vector.shape_cast %0 : vector<4x2x16xf32> to vector<8x16xf32>
    %9 = arith.truncf %8 : vector<8x16xf32> to vector<8x16xbf16>
    %cst = arith.constant dense<0.000000e+00> : vector<8x128xf32>
    %10 = tpu.matmul %9, %2, %cst {dimension_numbers = #tpu.dot_dimension_numbers<[1], [0], [0], [1], [0, 0, 1, 1], [], []>} : vector<8x16xbf16>, vector<16x128xbf16>, vector<8x128xf32> -> vector<8x128xf32>
    %11 = vector.broadcast %6 : vector<1x128xf32> to vector<8x128xf32>
    %12 = arith.addf %10, %11 : vector<8x128xf32>
    %13 = vector.shape_cast %12 : vector<8x128xf32> to vector<4x2x128xf32>
    %c0_17 = arith.constant 0 : index
    %c0_18 = arith.constant 0 : index
    %c0_19 = arith.constant 0 : index
    %14 = vector.load %arg1[%c0_17, %c0_18, %c0_19] : memref<2x2x32xf32, #tpu.memory_space<vmem>>, vector<1x2x32xf32>
    %15 = vector.shape_cast %14 : vector<1x2x32xf32> to vector<2x32xf32>
    %c1 = arith.constant 1 : index
    %c0_20 = arith.constant 0 : index
    %c0_21 = arith.constant 0 : index
    %16 = vector.load %arg1[%c1, %c0_20, %c0_21] : memref<2x2x32xf32, #tpu.memory_space<vmem>>, vector<1x2x32xf32>
    %17 = vector.shape_cast %16 : vector<1x2x32xf32> to vector<2x32xf32>
    %c0_22 = arith.constant 0 : index
    %c0_23 = arith.constant 0 : index
    %c0_24 = arith.constant 0 : index
    %18 = vector.load %arg2[%c0_22, %c0_23, %c0_24] : memref<2x2x32xf32, #tpu.memory_space<vmem>>, vector<1x2x32xf32>
    %19 = vector.shape_cast %18 : vector<1x2x32xf32> to vector<2x32xf32>
    %c1_25 = arith.constant 1 : index
    %c0_26 = arith.constant 0 : index
    %c0_27 = arith.constant 0 : index
    %20 = vector.load %arg2[%c1_25, %c0_26, %c0_27] : memref<2x2x32xf32, #tpu.memory_space<vmem>>, vector<1x2x32xf32>
    %21 = vector.shape_cast %20 : vector<1x2x32xf32> to vector<2x32xf32>
    %22 = vector.extract_strided_slice %13 {offsets = [0, 0, 0], sizes = [1, 2, 128], strides = [1, 1, 1]} : vector<4x2x128xf32> to vector<1x2x128xf32>
    %23 = vector.shape_cast %22 : vector<1x2x128xf32> to vector<2x128xf32>
    %24 = arith.truncf %15 : vector<2x32xf32> to vector<2x32xbf16>
    %cst_28 = arith.constant dense<0.000000e+00> : vector<2x128xf32>
    %25 = tpu.matmul %24, %4, %cst_28 {dimension_numbers = #tpu.dot_dimension_numbers<[1], [0], [0], [1], [0, 0, 1, 1], [], []>} : vector<2x32xbf16>, vector<32x128xbf16>, vector<2x128xf32> -> vector<2x128xf32>
    %26 = arith.addf %23, %25 : vector<2x128xf32>
    %27 = arith.negf %26 : vector<2x128xf32>
    %28 = math.exp %27 : vector<2x128xf32>
    %cst_29 = arith.constant 1.000000e+00 : f32
    %29 = vector.broadcast %cst_29 : f32 to vector<2x128xf32>
    %30 = arith.addf %29, %28 : vector<2x128xf32>
    %31 = arith.divf %29, %30 : vector<2x128xf32>
    %32 = math.tanh %26 : vector<2x128xf32>
    %33 = vector.extract_strided_slice %31 {offsets = [0, 0], sizes = [2, 32], strides = [1, 1]} : vector<2x128xf32> to vector<2x32xf32>
    %34 = vector.extract_strided_slice %31 {offsets = [0, 32], sizes = [2, 32], strides = [1, 1]} : vector<2x128xf32> to vector<2x32xf32>
    %35 = vector.extract_strided_slice %32 {offsets = [0, 64], sizes = [2, 32], strides = [1, 1]} : vector<2x128xf32> to vector<2x32xf32>
    %36 = vector.extract_strided_slice %31 {offsets = [0, 96], sizes = [2, 32], strides = [1, 1]} : vector<2x128xf32> to vector<2x32xf32>
    %37 = arith.mulf %34, %19 : vector<2x32xf32>
    %38 = arith.mulf %33, %35 : vector<2x32xf32>
    %39 = arith.addf %37, %38 : vector<2x32xf32>
    %40 = math.tanh %39 : vector<2x32xf32>
    %41 = arith.mulf %36, %40 : vector<2x32xf32>
    %42 = arith.truncf %41 : vector<2x32xf32> to vector<2x32xbf16>
    %cst_30 = arith.constant dense<0.000000e+00> : vector<2x128xf32>
    %43 = tpu.matmul %42, %3, %cst_30 {dimension_numbers = #tpu.dot_dimension_numbers<[1], [0], [0], [1], [0, 0, 1, 1], [], []>} : vector<2x32xbf16>, vector<32x128xbf16>, vector<2x128xf32> -> vector<2x128xf32>
    %44 = arith.truncf %17 : vector<2x32xf32> to vector<2x32xbf16>
    %cst_31 = arith.constant dense<0.000000e+00> : vector<2x128xf32>
    %45 = tpu.matmul %44, %5, %cst_31 {dimension_numbers = #tpu.dot_dimension_numbers<[1], [0], [0], [1], [0, 0, 1, 1], [], []>} : vector<2x32xbf16>, vector<32x128xbf16>, vector<2x128xf32> -> vector<2x128xf32>
    %46 = arith.addf %43, %45 : vector<2x128xf32>
    %47 = vector.broadcast %7 : vector<1x128xf32> to vector<2x128xf32>
    %48 = arith.addf %46, %47 : vector<2x128xf32>
    %49 = arith.negf %48 : vector<2x128xf32>
    %50 = math.exp %49 : vector<2x128xf32>
    %cst_32 = arith.constant 1.000000e+00 : f32
    %51 = vector.broadcast %cst_32 : f32 to vector<2x128xf32>
    %52 = arith.addf %51, %50 : vector<2x128xf32>
    %53 = arith.divf %51, %52 : vector<2x128xf32>
    %54 = math.tanh %48 : vector<2x128xf32>
    %55 = vector.extract_strided_slice %53 {offsets = [0, 0], sizes = [2, 32], strides = [1, 1]} : vector<2x128xf32> to vector<2x32xf32>
    %56 = vector.extract_strided_slice %53 {offsets = [0, 32], sizes = [2, 32], strides = [1, 1]} : vector<2x128xf32> to vector<2x32xf32>
    %57 = vector.extract_strided_slice %54 {offsets = [0, 64], sizes = [2, 32], strides = [1, 1]} : vector<2x128xf32> to vector<2x32xf32>
    %58 = vector.extract_strided_slice %53 {offsets = [0, 96], sizes = [2, 32], strides = [1, 1]} : vector<2x128xf32> to vector<2x32xf32>
    %59 = arith.mulf %56, %21 : vector<2x32xf32>
    %60 = arith.mulf %55, %57 : vector<2x32xf32>
    %61 = arith.addf %59, %60 : vector<2x32xf32>
    %62 = math.tanh %61 : vector<2x32xf32>
    %63 = arith.mulf %58, %62 : vector<2x32xf32>
    %64 = vector.extract_strided_slice %13 {offsets = [1, 0, 0], sizes = [1, 2, 128], strides = [1, 1, 1]} : vector<4x2x128xf32> to vector<1x2x128xf32>
    %65 = vector.shape_cast %64 : vector<1x2x128xf32> to vector<2x128xf32>
    %66 = arith.truncf %41 : vector<2x32xf32> to vector<2x32xbf16>
    %cst_33 = arith.constant dense<0.000000e+00> : vector<2x128xf32>
    %67 = tpu.matmul %66, %4, %cst_33 {dimension_numbers = #tpu.dot_dimension_numbers<[1], [0], [0], [1], [0, 0, 1, 1], [], []>} : vector<2x32xbf16>, vector<32x128xbf16>, vector<2x128xf32> -> vector<2x128xf32>
    %68 = arith.addf %65, %67 : vector<2x128xf32>
    %69 = arith.negf %68 : vector<2x128xf32>
    %70 = math.exp %69 : vector<2x128xf32>
    %cst_34 = arith.constant 1.000000e+00 : f32
    %71 = vector.broadcast %cst_34 : f32 to vector<2x128xf32>
    %72 = arith.addf %71, %70 : vector<2x128xf32>
    %73 = arith.divf %71, %72 : vector<2x128xf32>
    %74 = math.tanh %68 : vector<2x128xf32>
    %75 = vector.extract_strided_slice %73 {offsets = [0, 0], sizes = [2, 32], strides = [1, 1]} : vector<2x128xf32> to vector<2x32xf32>
    %76 = vector.extract_strided_slice %73 {offsets = [0, 32], sizes = [2, 32], strides = [1, 1]} : vector<2x128xf32> to vector<2x32xf32>
    %77 = vector.extract_strided_slice %74 {offsets = [0, 64], sizes = [2, 32], strides = [1, 1]} : vector<2x128xf32> to vector<2x32xf32>
    %78 = vector.extract_strided_slice %73 {offsets = [0, 96], sizes = [2, 32], strides = [1, 1]} : vector<2x128xf32> to vector<2x32xf32>
    %79 = arith.mulf %76, %39 : vector<2x32xf32>
    %80 = arith.mulf %75, %77 : vector<2x32xf32>
    %81 = arith.addf %79, %80 : vector<2x32xf32>
    %82 = math.tanh %81 : vector<2x32xf32>
    %83 = arith.mulf %78, %82 : vector<2x32xf32>
    %84 = arith.truncf %83 : vector<2x32xf32> to vector<2x32xbf16>
    %cst_35 = arith.constant dense<0.000000e+00> : vector<2x128xf32>
    %85 = tpu.matmul %84, %3, %cst_35 {dimension_numbers = #tpu.dot_dimension_numbers<[1], [0], [0], [1], [0, 0, 1, 1], [], []>} : vector<2x32xbf16>, vector<32x128xbf16>, vector<2x128xf32> -> vector<2x128xf32>
    %86 = arith.truncf %63 : vector<2x32xf32> to vector<2x32xbf16>
    %cst_36 = arith.constant dense<0.000000e+00> : vector<2x128xf32>
    %87 = tpu.matmul %86, %5, %cst_36 {dimension_numbers = #tpu.dot_dimension_numbers<[1], [0], [0], [1], [0, 0, 1, 1], [], []>} : vector<2x32xbf16>, vector<32x128xbf16>, vector<2x128xf32> -> vector<2x128xf32>
    %88 = arith.addf %85, %87 : vector<2x128xf32>
    %89 = vector.broadcast %7 : vector<1x128xf32> to vector<2x128xf32>
    %90 = arith.addf %88, %89 : vector<2x128xf32>
    %91 = arith.negf %90 : vector<2x128xf32>
    %92 = math.exp %91 : vector<2x128xf32>
    %cst_37 = arith.constant 1.000000e+00 : f32
    %93 = vector.broadcast %cst_37 : f32 to vector<2x128xf32>
    %94 = arith.addf %93, %92 : vector<2x128xf32>
    %95 = arith.divf %93, %94 : vector<2x128xf32>
    %96 = math.tanh %90 : vector<2x128xf32>
    %97 = vector.extract_strided_slice %95 {offsets = [0, 0], sizes = [2, 32], strides = [1, 1]} : vector<2x128xf32> to vector<2x32xf32>
    %98 = vector.extract_strided_slice %95 {offsets = [0, 32], sizes = [2, 32], strides = [1, 1]} : vector<2x128xf32> to vector<2x32xf32>
    %99 = vector.extract_strided_slice %96 {offsets = [0, 64], sizes = [2, 32], strides = [1, 1]} : vector<2x128xf32> to vector<2x32xf32>
    %100 = vector.extract_strided_slice %95 {offsets = [0, 96], sizes = [2, 32], strides = [1, 1]} : vector<2x128xf32> to vector<2x32xf32>
    %101 = arith.mulf %98, %61 : vector<2x32xf32>
    %102 = arith.mulf %97, %99 : vector<2x32xf32>
    %103 = arith.addf %101, %102 : vector<2x32xf32>
    %104 = math.tanh %103 : vector<2x32xf32>
    %105 = arith.mulf %100, %104 : vector<2x32xf32>
    %106 = vector.extract_strided_slice %13 {offsets = [2, 0, 0], sizes = [1, 2, 128], strides = [1, 1, 1]} : vector<4x2x128xf32> to vector<1x2x128xf32>
    %107 = vector.shape_cast %106 : vector<1x2x128xf32> to vector<2x128xf32>
    %108 = arith.truncf %83 : vector<2x32xf32> to vector<2x32xbf16>
    %cst_38 = arith.constant dense<0.000000e+00> : vector<2x128xf32>
    %109 = tpu.matmul %108, %4, %cst_38 {dimension_numbers = #tpu.dot_dimension_numbers<[1], [0], [0], [1], [0, 0, 1, 1], [], []>} : vector<2x32xbf16>, vector<32x128xbf16>, vector<2x128xf32> -> vector<2x128xf32>
    %110 = arith.addf %107, %109 : vector<2x128xf32>
    %111 = arith.negf %110 : vector<2x128xf32>
    %112 = math.exp %111 : vector<2x128xf32>
    %cst_39 = arith.constant 1.000000e+00 : f32
    %113 = vector.broadcast %cst_39 : f32 to vector<2x128xf32>
    %114 = arith.addf %113, %112 : vector<2x128xf32>
    %115 = arith.divf %113, %114 : vector<2x128xf32>
    %116 = math.tanh %110 : vector<2x128xf32>
    %117 = vector.extract_strided_slice %115 {offsets = [0, 0], sizes = [2, 32], strides = [1, 1]} : vector<2x128xf32> to vector<2x32xf32>
    %118 = vector.extract_strided_slice %115 {offsets = [0, 32], sizes = [2, 32], strides = [1, 1]} : vector<2x128xf32> to vector<2x32xf32>
    %119 = vector.extract_strided_slice %116 {offsets = [0, 64], sizes = [2, 32], strides = [1, 1]} : vector<2x128xf32> to vector<2x32xf32>
    %120 = vector.extract_strided_slice %115 {offsets = [0, 96], sizes = [2, 32], strides = [1, 1]} : vector<2x128xf32> to vector<2x32xf32>
    %121 = arith.mulf %118, %81 : vector<2x32xf32>
    %122 = arith.mulf %117, %119 : vector<2x32xf32>
    %123 = arith.addf %121, %122 : vector<2x32xf32>
    %124 = math.tanh %123 : vector<2x32xf32>
    %125 = arith.mulf %120, %124 : vector<2x32xf32>
    %126 = arith.truncf %125 : vector<2x32xf32> to vector<2x32xbf16>
    %cst_40 = arith.constant dense<0.000000e+00> : vector<2x128xf32>
    %127 = tpu.matmul %126, %3, %cst_40 {dimension_numbers = #tpu.dot_dimension_numbers<[1], [0], [0], [1], [0, 0, 1, 1], [], []>} : vector<2x32xbf16>, vector<32x128xbf16>, vector<2x128xf32> -> vector<2x128xf32>
    %128 = arith.truncf %105 : vector<2x32xf32> to vector<2x32xbf16>
    %cst_41 = arith.constant dense<0.000000e+00> : vector<2x128xf32>
    %129 = tpu.matmul %128, %5, %cst_41 {dimension_numbers = #tpu.dot_dimension_numbers<[1], [0], [0], [1], [0, 0, 1, 1], [], []>} : vector<2x32xbf16>, vector<32x128xbf16>, vector<2x128xf32> -> vector<2x128xf32>
    %130 = arith.addf %127, %129 : vector<2x128xf32>
    %131 = vector.broadcast %7 : vector<1x128xf32> to vector<2x128xf32>
    %132 = arith.addf %130, %131 : vector<2x128xf32>
    %133 = arith.negf %132 : vector<2x128xf32>
    %134 = math.exp %133 : vector<2x128xf32>
    %cst_42 = arith.constant 1.000000e+00 : f32
    %135 = vector.broadcast %cst_42 : f32 to vector<2x128xf32>
    %136 = arith.addf %135, %134 : vector<2x128xf32>
    %137 = arith.divf %135, %136 : vector<2x128xf32>
    %138 = math.tanh %132 : vector<2x128xf32>
    %139 = vector.extract_strided_slice %137 {offsets = [0, 0], sizes = [2, 32], strides = [1, 1]} : vector<2x128xf32> to vector<2x32xf32>
    %140 = vector.extract_strided_slice %137 {offsets = [0, 32], sizes = [2, 32], strides = [1, 1]} : vector<2x128xf32> to vector<2x32xf32>
    %141 = vector.extract_strided_slice %138 {offsets = [0, 64], sizes = [2, 32], strides = [1, 1]} : vector<2x128xf32> to vector<2x32xf32>
    %142 = vector.extract_strided_slice %137 {offsets = [0, 96], sizes = [2, 32], strides = [1, 1]} : vector<2x128xf32> to vector<2x32xf32>
    %143 = arith.mulf %140, %103 : vector<2x32xf32>
    %144 = arith.mulf %139, %141 : vector<2x32xf32>
    %145 = arith.addf %143, %144 : vector<2x32xf32>
    %146 = math.tanh %145 : vector<2x32xf32>
    %147 = arith.mulf %142, %146 : vector<2x32xf32>
    %148 = vector.extract_strided_slice %13 {offsets = [3, 0, 0], sizes = [1, 2, 128], strides = [1, 1, 1]} : vector<4x2x128xf32> to vector<1x2x128xf32>
    %149 = vector.shape_cast %148 : vector<1x2x128xf32> to vector<2x128xf32>
    %150 = arith.truncf %125 : vector<2x32xf32> to vector<2x32xbf16>
    %cst_43 = arith.constant dense<0.000000e+00> : vector<2x128xf32>
    %151 = tpu.matmul %150, %4, %cst_43 {dimension_numbers = #tpu.dot_dimension_numbers<[1], [0], [0], [1], [0, 0, 1, 1], [], []>} : vector<2x32xbf16>, vector<32x128xbf16>, vector<2x128xf32> -> vector<2x128xf32>
    %152 = arith.addf %149, %151 : vector<2x128xf32>
    %153 = arith.negf %152 : vector<2x128xf32>
    %154 = math.exp %153 : vector<2x128xf32>
    %cst_44 = arith.constant 1.000000e+00 : f32
    %155 = vector.broadcast %cst_44 : f32 to vector<2x128xf32>
    %156 = arith.addf %155, %154 : vector<2x128xf32>
    %157 = arith.divf %155, %156 : vector<2x128xf32>
    %158 = math.tanh %152 : vector<2x128xf32>
    %159 = vector.extract_strided_slice %157 {offsets = [0, 0], sizes = [2, 32], strides = [1, 1]} : vector<2x128xf32> to vector<2x32xf32>
    %160 = vector.extract_strided_slice %157 {offsets = [0, 32], sizes = [2, 32], strides = [1, 1]} : vector<2x128xf32> to vector<2x32xf32>
    %161 = vector.extract_strided_slice %158 {offsets = [0, 64], sizes = [2, 32], strides = [1, 1]} : vector<2x128xf32> to vector<2x32xf32>
    %162 = vector.extract_strided_slice %157 {offsets = [0, 96], sizes = [2, 32], strides = [1, 1]} : vector<2x128xf32> to vector<2x32xf32>
    %163 = arith.mulf %160, %123 : vector<2x32xf32>
    %164 = arith.mulf %159, %161 : vector<2x32xf32>
    %165 = arith.addf %163, %164 : vector<2x32xf32>
    %166 = math.tanh %165 : vector<2x32xf32>
    %167 = arith.mulf %162, %166 : vector<2x32xf32>
    %168 = arith.truncf %167 : vector<2x32xf32> to vector<2x32xbf16>
    %cst_45 = arith.constant dense<0.000000e+00> : vector<2x128xf32>
    %169 = tpu.matmul %168, %3, %cst_45 {dimension_numbers = #tpu.dot_dimension_numbers<[1], [0], [0], [1], [0, 0, 1, 1], [], []>} : vector<2x32xbf16>, vector<32x128xbf16>, vector<2x128xf32> -> vector<2x128xf32>
    %170 = arith.truncf %147 : vector<2x32xf32> to vector<2x32xbf16>
    %cst_46 = arith.constant dense<0.000000e+00> : vector<2x128xf32>
    %171 = tpu.matmul %170, %5, %cst_46 {dimension_numbers = #tpu.dot_dimension_numbers<[1], [0], [0], [1], [0, 0, 1, 1], [], []>} : vector<2x32xbf16>, vector<32x128xbf16>, vector<2x128xf32> -> vector<2x128xf32>
    %172 = arith.addf %169, %171 : vector<2x128xf32>
    %173 = vector.broadcast %7 : vector<1x128xf32> to vector<2x128xf32>
    %174 = arith.addf %172, %173 : vector<2x128xf32>
    %175 = arith.negf %174 : vector<2x128xf32>
    %176 = math.exp %175 : vector<2x128xf32>
    %cst_47 = arith.constant 1.000000e+00 : f32
    %177 = vector.broadcast %cst_47 : f32 to vector<2x128xf32>
    %178 = arith.addf %177, %176 : vector<2x128xf32>
    %179 = arith.divf %177, %178 : vector<2x128xf32>
    %180 = math.tanh %174 : vector<2x128xf32>
    %181 = vector.extract_strided_slice %179 {offsets = [0, 0], sizes = [2, 32], strides = [1, 1]} : vector<2x128xf32> to vector<2x32xf32>
    %182 = vector.extract_strided_slice %179 {offsets = [0, 32], sizes = [2, 32], strides = [1, 1]} : vector<2x128xf32> to vector<2x32xf32>
    %183 = vector.extract_strided_slice %180 {offsets = [0, 64], sizes = [2, 32], strides = [1, 1]} : vector<2x128xf32> to vector<2x32xf32>
    %184 = vector.extract_strided_slice %179 {offsets = [0, 96], sizes = [2, 32], strides = [1, 1]} : vector<2x128xf32> to vector<2x32xf32>
    %185 = arith.mulf %182, %145 : vector<2x32xf32>
    %186 = arith.mulf %181, %183 : vector<2x32xf32>
    %187 = arith.addf %185, %186 : vector<2x32xf32>
    %188 = math.tanh %187 : vector<2x32xf32>
    %189 = arith.mulf %184, %188 : vector<2x32xf32>
    %c0_48 = arith.constant 0 : index
    %c0_49 = arith.constant 0 : index
    %c0_50 = arith.constant 0 : index
    %190 = vector.load %arg19[%c0_48, %c0_49, %c0_50] : memref<2x2x32xf32, #tpu.memory_space<vmem>>, vector<1x2x32xf32>
    %191 = vector.shape_cast %190 : vector<1x2x32xf32> to vector<2x32xf32>
    %192 = vector.shape_cast %167 : vector<2x32xf32> to vector<1x2x32xf32>
    tpu.vector_store %arg19[%c0_48, %c0_49, %c0_50], %192 {strides = array<i32>} : memref<2x2x32xf32, #tpu.memory_space<vmem>>, vector<1x2x32xf32>,
    %c0_51 = arith.constant 0 : index
    %c0_52 = arith.constant 0 : index
    %c0_53 = arith.constant 0 : index
    %193 = vector.load %arg20[%c0_51, %c0_52, %c0_53] : memref<2x2x32xf32, #tpu.memory_space<vmem>>, vector<1x2x32xf32>
    %194 = vector.shape_cast %193 : vector<1x2x32xf32> to vector<2x32xf32>
    %195 = vector.shape_cast %165 : vector<2x32xf32> to vector<1x2x32xf32>
    tpu.vector_store %arg20[%c0_51, %c0_52, %c0_53], %195 {strides = array<i32>} : memref<2x2x32xf32, #tpu.memory_space<vmem>>, vector<1x2x32xf32>,
    %c1_54 = arith.constant 1 : index
    %c0_55 = arith.constant 0 : index
    %c0_56 = arith.constant 0 : index
    %196 = vector.load %arg19[%c1_54, %c0_55, %c0_56] : memref<2x2x32xf32, #tpu.memory_space<vmem>>, vector<1x2x32xf32>
    %197 = vector.shape_cast %196 : vector<1x2x32xf32> to vector<2x32xf32>
    %198 = vector.shape_cast %189 : vector<2x32xf32> to vector<1x2x32xf32>
    tpu.vector_store %arg19[%c1_54, %c0_55, %c0_56], %198 {strides = array<i32>} : memref<2x2x32xf32, #tpu.memory_space<vmem>>, vector<1x2x32xf32>,
    %c1_57 = arith.constant 1 : index
    %c0_58 = arith.constant 0 : index
    %c0_59 = arith.constant 0 : index
    %199 = vector.load %arg20[%c1_57, %c0_58, %c0_59] : memref<2x2x32xf32, #tpu.memory_space<vmem>>, vector<1x2x32xf32>
    %200 = vector.shape_cast %199 : vector<1x2x32xf32> to vector<2x32xf32>
    %201 = vector.shape_cast %187 : vector<2x32xf32> to vector<1x2x32xf32>
    tpu.vector_store %arg20[%c1_57, %c0_58, %c0_59], %201 {strides = array<i32>} : memref<2x2x32xf32, #tpu.memory_space<vmem>>, vector<1x2x32xf32>,
    %202 = vector.shape_cast %167 : vector<2x32xf32> to vector<2x1x32xf32>
    %203 = vector.shape_cast %189 : vector<2x32xf32> to vector<2x1x32xf32>
    %204 = tpu.concatenate %202, %203 in 1 : vector<2x1x32xf32>, vector<2x1x32xf32> -> vector<2x2x32xf32>
    %205 = vector.shape_cast %204 : vector<2x2x32xf32> to vector<4x32xf32>
    %206 = arith.truncf %205 : vector<4x32xf32> to vector<4x32xbf16>
    %c0_60 = arith.constant 0 : index
    %c0_61 = arith.constant 0 : index
    %207 = vector.load %arg4[%c0_60, %c0_61] : memref<32x32xbf16, #tpu.memory_space<vmem>>, vector<32x32xbf16>
    %cst_62 = arith.constant dense<0.000000e+00> : vector<4x32xf32>
    %208 = tpu.matmul %206, %207, %cst_62 {dimension_numbers = #tpu.dot_dimension_numbers<[1], [0], [0], [1], [0, 0, 1, 1], [], []>} : vector<4x32xbf16>, vector<32x32xbf16>, vector<4x32xf32> -> vector<4x32xf32>
    %c0_63 = arith.constant 0 : index
    %c0_64 = arith.constant 0 : index
    %209 = vector.load %arg5[%c0_63, %c0_64] : memref<1x32xf32, #tpu.memory_space<vmem>>, vector<1x32xf32>
    %210 = vector.broadcast %209 : vector<1x32xf32> to vector<4x32xf32>
    %211 = arith.addf %208, %210 : vector<4x32xf32>
    %212 = vector.shape_cast %1 : vector<2x8x32xf32> to vector<16x32xf32>
    %213 = arith.truncf %212 : vector<16x32xf32> to vector<16x32xbf16>
    %c0_65 = arith.constant 0 : index
    %c0_66 = arith.constant 0 : index
    %214 = vector.load %arg6[%c0_65, %c0_66] : memref<32x32xbf16, #tpu.memory_space<vmem>>, vector<32x32xbf16>
    %cst_67 = arith.constant dense<0.000000e+00> : vector<16x32xf32>
    %215 = tpu.matmul %213, %214, %cst_67 {dimension_numbers = #tpu.dot_dimension_numbers<[1], [0], [0], [1], [0, 0, 1, 1], [], []>} : vector<16x32xbf16>, vector<32x32xbf16>, vector<16x32xf32> -> vector<16x32xf32>
    %c0_68 = arith.constant 0 : index
    %c0_69 = arith.constant 0 : index
    %216 = vector.load %arg7[%c0_68, %c0_69] : memref<1x32xf32, #tpu.memory_space<vmem>>, vector<1x32xf32>
    %217 = vector.broadcast %216 : vector<1x32xf32> to vector<16x32xf32>
    %218 = arith.addf %215, %217 : vector<16x32xf32>
    %219 = vector.shape_cast %211 : vector<4x32xf32> to vector<2x2x1x32xf32>
    %220 = vector.shape_cast %218 : vector<16x32xf32> to vector<2x1x8x32xf32>
    %221 = vector.broadcast %219 : vector<2x2x1x32xf32> to vector<2x2x8x32xf32>
    %222 = vector.broadcast %220 : vector<2x1x8x32xf32> to vector<2x2x8x32xf32>
    %223 = arith.addf %221, %222 : vector<2x2x8x32xf32>
    %224 = math.tanh %223 : vector<2x2x8x32xf32>
    %c0_70 = arith.constant 0 : index
    %c0_71 = arith.constant 0 : index
    %225 = vector.load %arg8[%c0_70, %c0_71] : memref<1x32xf32, #tpu.memory_space<vmem>>, vector<1x32xf32>
    %226 = vector.shape_cast %225 : vector<1x32xf32> to vector<1x1x1x32xf32>
    %227 = vector.broadcast %226 : vector<1x1x1x32xf32> to vector<2x2x8x32xf32>
    %228 = arith.mulf %224, %227 : vector<2x2x8x32xf32>
    %cst_72 = arith.constant dense<0.000000e+00> : vector<2x2x8xf32>
    %229 = vector.multi_reduction <add>, %228, %cst_72 [3] : vector<2x2x8x32xf32> to vector<2x2x8xf32>
    %230 = math.exp %229 : vector<2x2x8xf32>
    %cst_73 = arith.constant dense<0.000000e+00> : vector<2x2xf32>
    %231 = vector.multi_reduction <add>, %230, %cst_73 [2] : vector<2x2x8xf32> to vector<2x2xf32>
    %232 = vector.shape_cast %231 : vector<2x2xf32> to vector<2x2x1xf32>
    %233 = tpu.reciprocal %232 {approx = true} : vector<2x2x1xf32> -> vector<2x2x1xf32>
    %234 = vector.broadcast %233 : vector<2x2x1xf32> to vector<2x2x8xf32>
    %235 = arith.mulf %230, %234 : vector<2x2x8xf32>
    %236 = arith.truncf %235 : vector<2x2x8xf32> to vector<2x2x8xbf16>
    %237 = arith.truncf %1 : vector<2x8x32xf32> to vector<2x8x32xbf16>
    "tpu.trace_start"() <{level = 10 : i32, message = "bls,bsh->blh"}> : () -> ()
    %cst_74 = arith.constant dense<0.000000e+00> : vector<2x2x32xf32>
    %238 = tpu.matmul %236, %237, %cst_74 {dimension_numbers = #tpu.dot_dimension_numbers<[2], [1], [1], [2], [0, 0, 0, 1, 1, 2], [0], [0]>} : vector<2x2x8xbf16>, vector<2x8x32xbf16>, vector<2x2x32xf32> -> vector<2x2x32xf32>
    "tpu.trace_stop"() : () -> ()
    %239 = vector.shape_cast %238 : vector<2x2x32xf32> to vector<4x32xf32>
    %240 = arith.truncf %239 : vector<4x32xf32> to vector<4x32xbf16>
    %c0_75 = arith.constant 0 : index
    %c0_76 = arith.constant 0 : index
    %241 = vector.load %arg9[%c0_75, %c0_76] : memref<32x128xbf16, #tpu.memory_space<vmem>>, vector<32x128xbf16>
    %cst_77 = arith.constant dense<0.000000e+00> : vector<4x128xf32>
    %242 = tpu.matmul %240, %241, %cst_77 {dimension_numbers = #tpu.dot_dimension_numbers<[1], [0], [0], [1], [0, 0, 1, 1], [], []>} : vector<4x32xbf16>, vector<32x128xbf16>, vector<4x128xf32> -> vector<4x128xf32>
    %243 = arith.truncf %205 : vector<4x32xf32> to vector<4x32xbf16>
    %c0_78 = arith.constant 0 : index
    %c0_79 = arith.constant 0 : index
    %244 = vector.load %arg10[%c0_78, %c0_79] : memref<32x128xbf16, #tpu.memory_space<vmem>>, vector<32x128xbf16>
    %cst_80 = arith.constant dense<0.000000e+00> : vector<4x128xf32>
    %245 = tpu.matmul %243, %244, %cst_80 {dimension_numbers = #tpu.dot_dimension_numbers<[1], [0], [0], [1], [0, 0, 1, 1], [], []>} : vector<4x32xbf16>, vector<32x128xbf16>, vector<4x128xf32> -> vector<4x128xf32>
    %246 = arith.addf %242, %245 : vector<4x128xf32>
    %c0_81 = arith.constant 0 : index
    %c0_82 = arith.constant 0 : index
    %247 = vector.load %arg11[%c0_81, %c0_82] : memref<1x128xf32, #tpu.memory_space<vmem>>, vector<1x128xf32>
    %248 = vector.broadcast %247 : vector<1x128xf32> to vector<4x128xf32>
    %249 = arith.addf %246, %248 : vector<4x128xf32>
    %c0_83 = arith.constant 0 : index
    %c0_84 = arith.constant 0 : index
    %250 = vector.load %arg18[%c0_83, %c0_84] : memref<4x128xf32, #tpu.memory_space<vmem>>, vector<4x128xf32>
    tpu.vector_store %arg18[%c0_83, %c0_84], %249 {strides = array<i32>} : memref<4x128xf32, #tpu.memory_space<vmem>>, vector<4x128xf32>,
    return
  }
}

</mosaic_0001>

<bundles_post_ra>
// kernel: tpu_custom_call.1
= control target key start
LH: loop header
LB: loop body
LE: loop exit
PB: predicated region body
PF: predicated region fallthrough
CT: control target
= control target key end

     0   :  { %s3235_s0 = inlined_call_operand.hbm [shape: f32[4,2,16], index: 0, kind: input, shape index: {}]   ;;  %s3236_s1 = inlined_call_operand.hbm [shape: f32[2,2,32], index: 1, kind: input, shape index: {}]   ;;  %s3237_s2 = inlined_call_operand.hbm [shape: f32[2,2,32], index: 2, kind: input, shape index: {}]   ;;  %s3238_s3 = inlined_call_operand.hbm [shape: f32[2,8,32], index: 3, kind: input, shape index: {}]   ;;  %s3239_s4 = inlined_call_operand.hbm [shape: bf16[32,32], index: 4, kind: input, shape index: {}]   ;;  %s3240_s5 = inlined_call_operand.vmem [shape: f32[1,32], index: 5, kind: input, shape index: {}]   ;;  %s3241_s6 = inlined_call_operand.vmem [shape: bf16[32,32], index: 6, kind: input, shape index: {}]   ;;  %s3242_s7 = inlined_call_operand.hbm [shape: f32[1,32], index: 7, kind: input, shape index: {}]   ;;  %s3243_s8 = inlined_call_operand.hbm [shape: f32[1,32], index: 8, kind: input, shape index: {}]   ;;  %s3244_s9 = inlined_call_operand.vmem [shape: bf16[32,128], index: 9, kind: input, shape index: {}]   ;;  %s3245_s10 = inlined_call_operand.hbm [shape: bf16[32,128], index: 10, kind: input, shape index: {}]   ;;  %s3246_s11 = inlined_call_operand.hbm [shape: f32[1,128], index: 11, kind: input, shape index: {}]   ;;  %s3247_s12 = inlined_call_operand.hbm [shape: bf16[16,128], index: 12, kind: input, shape index: {}]   ;;  %s3248_s13 = inlined_call_operand.vmem [shape: bf16[32,128], index: 13, kind: input, shape index: {}]   ;;  %s3249_s14 = inlined_call_operand.vmem [shape: f32[1,128], index: 14, kind: input, shape index: {}]   ;;  %s3250_s15 = inlined_call_operand.hbm [shape: bf16[32,128], index: 15, kind: input, shape index: {}]   ;;  %s3251_s16 = inlined_call_operand.hbm [shape: bf16[32,128], index: 16, kind: input, shape index: {}]   ;;  %s3252_s17 = inlined_call_operand.vmem [shape: f32[1,128], index: 17, kind: input, shape index: {}]   ;;  %s3253_s18 = inlined_call_operand.hbm [shape: f32[4,128], index: 18, kind: output, shape index: {0}]   ;;  %s3254_s19 = inlined_call_operand.hbm [shape: f32[2,2,32], index: 19, kind: output, shape index: {1}]   ;;  %s3255_s20 = inlined_call_operand.hbm [shape: f32[2,2,32], index: 20, kind: output, shape index: {2}]  }
   0x1   :  { %3268 = sst [smem:[#allocation35_spill]] %s3235_s0 }
   0x2   :  { %3269 = sst [smem:[#allocation36_spill]] %s3236_s1 }
   0x3   :  { %3270 = sst [smem:[#allocation37_spill]] %s3237_s2 }
   0x4   :  { %3271 = sst [smem:[#allocation38_spill]] %s3238_s3 }
   0x5   :  { %3272 = sst [smem:[#allocation39_spill]] %s3239_s4 }
   0x6   :  { %3273 = sst [smem:[#allocation40_spill]] %s3253_s18 }
   0x7   :  { %26 = vsyncpa [#allocation3], 0 }
   0x8   :  { %27 = vsyncpa [#allocation6], 0 }
   0x9   :  { %28 = vsyncpa [#allocation9], 0 }
   0xa   :  { %29 = vsyncpa [#allocation12], 0 }
   0xb   :  { %30 = vsyncpa [#allocation15], 0 }
   0xc   :  { %31 = vsyncpa [#allocation18], 0 }
   0xd   :  { %32 = vsyncpa [#allocation21], 0 }
   0xe   :  { %33 = vsyncpa [#allocation4], 0 }
   0xf   :  { %34 = vsyncpa [#allocation24], 0  ;;  %s2576_s1 = smov [#allocation5]   ;;  %s2577_s23 = smov [#allocation8]  }
  0x10   :  { %s52_s22 = sshll.u32 %s2576_s1, 4  ;;  %s76_s24 = sshll.u32 %s2577_s23, 4  ;;  %s53_s22 = int_to_ptr.vmem [resolvable:$true] %s52_s22  ;;  %s2708_s24 = int_to_ptr.vmem [resolvable:$true] %s76_s24 }
  0x11   :  { %s3274_s3 = sld [smem:[#allocation36_spill]] }
  0x17   :  { %s2228_s26 = scalar_lea.hbm %s3274_s3, 64 }
  0x18   :  { %p2229_p0 = scmp.ne.s32.totalorder %s3274_s3, %s2228_s26  ;;  %p2232_p1 = scmp.lt.u32.totalorder %s2228_s26, %s3274_s3 }
  0x1a   :  { %p2234_p2 = pnand %p2232_p1, %p2229_p0 }
  0x1c   :  { %2237 = shalt.err (!%p2234_p2)
}
  0x1d   :  { %s2238_s30 = scalar_lea.vmem %s53_s22, 64  ;;  %p2243_p4 = scmp.lt.s32.totalorder %s53_s22, %s53_s22 }
  0x1e   :  { %p2239_p3 = scmp.ne.s32.totalorder %s53_s22, %s2238_s30  ;;  %p2244_p5 = scmp.lt.s32.totalorder %s2238_s30, %s2238_s30 }
  0x20   :  { %p2245_p6 = por %p2244_p5, %p2243_p4 }
  0x22   :  { %p2246_p7 = pnand %p2245_p6, %p2239_p3 }
  0x24   :  { %2249 = shalt.err (!%p2246_p7)
}
  0x25   :  { %s3262_s0 = smov 32   ;;  %s3264_s21 = smov 2  }
  0x26   :  { %58 = dma.hbm_to_vmem [thread:$0]  %s3274_s3, 64, %s53_s22, [#allocation6], %s3262_s0, %s3262_s0, %s3264_s21  }
  0x27   :  { %s3275_s26 = sld [smem:[#allocation38_spill]] }
  0x2d   :  { %s2250_s27 = scalar_lea.hbm %s3275_s26, 256 }
  0x2e   :  { %p2251_p8 = scmp.ne.s32.totalorder %s3275_s26, %s2250_s27  ;;  %p2254_p9 = scmp.lt.u32.totalorder %s2250_s27, %s3275_s26 }
  0x30   :  { %p2256_p10 = pnand %p2254_p9, %p2251_p8 }
  0x32   :  { %2259 = shalt.err (!%p2256_p10)
}
  0x33   :  { %s2260_s18 = scalar_lea.vmem %s2708_s24, 256  ;;  %p2265_p12 = scmp.lt.s32.totalorder %s2708_s24, %s2708_s24 }
  0x34   :  { %p2261_p11 = scmp.ne.s32.totalorder %s2708_s24, %s2260_s18  ;;  %p2266_p13 = scmp.lt.s32.totalorder %s2260_s18, %s2260_s18 }
  0x36   :  { %p2267_p0 = por %p2266_p13, %p2265_p12 }
  0x38   :  { %p2268_p1 = pnand %p2267_p0, %p2261_p11 }
  0x3a   :  { %2271 = shalt.err (!%p2268_p1)
}
  0x3b   :  { %s2580_s22 = smov 128   ;;  %s2581_s3 = smov 8  }
  0x3c   :  { %82 = dma.hbm_to_vmem [thread:$0]  %s3275_s26, 256, %s2708_s24, [#allocation9], %s2580_s22, %s2580_s22, %s2581_s3  }
  0x3d   :  { %s2582_s2 = smov [#allocation11]   ;;  %s2272_s4 = scalar_lea.hbm %s3242_s7, 16 }
  0x3e   :  { %s105_s25 = sshll.u32 %s2582_s2, 4  ;;  %p2273_p2 = scmp.ne.s32.totalorder %s3242_s7, %s2272_s4  ;;  %s106_s25 = int_to_ptr.vmem [resolvable:$true] %s105_s25 }
  0x3f   :  { %p2276_p3 = scmp.lt.u32.totalorder %s2272_s4, %s3242_s7 }
  0x41   :  { %p2278_p4 = pnand %p2276_p3, %p2273_p2 }
  0x43   :  { %2281 = shalt.err (!%p2278_p4)
}
  0x44   :  { %s2282_s21 = scalar_lea.vmem %s106_s25, 16  ;;  %s2286_s24 = scalar_lea.vmem %s106_s25, 32 }
  0x45   :  { %p2283_p5 = scmp.ne.s32.totalorder %s106_s25, %s2282_s21  ;;  %p2287_p6 = scmp.lt.s32.totalorder %s106_s25, %s106_s25 }
  0x46   :  { %p2288_p7 = scmp.lt.s32.totalorder %s2286_s24, %s2282_s21 }
  0x48   :  { %p2289_p8 = por %p2288_p7, %p2287_p6 }
  0x4a   :  { %p2290_p9 = pnand %p2289_p8, %p2283_p5 }
  0x4c   :  { %2293 = shalt.err (!%p2290_p9)
}
  0x4d   :  { %108 = dma.hbm_to_vmem [thread:$0]  %s3242_s7, 16, %s106_s25, [#allocation12]  }
  0x4e   :  { %s2583_s3 = smov [#allocation14]   ;;  %s2584_s23 = smov [#allocation17]  }
  0x4f   :  { %s126_s1 = sshll.u32 %s2583_s3, 4  ;;  %s148_s0 = sshll.u32 %s2584_s23, 4  ;;  %s127_s1 = int_to_ptr.vmem [resolvable:$true] %s126_s1  ;;  %s149_s0 = int_to_ptr.vmem [resolvable:$true] %s148_s0 }
  0x50   :  { %s2294_s28 = scalar_lea.hbm %s3245_s10, 256 }
  0x51   :  { %p2295_p10 = scmp.ne.s32.totalorder %s3245_s10, %s2294_s28  ;;  %p2298_p11 = scmp.lt.u32.totalorder %s2294_s28, %s3245_s10 }
  0x53   :  { %p2300_p12 = pnand %p2298_p11, %p2295_p10 }
  0x55   :  { %2303 = shalt.err (!%p2300_p12)
}
  0x56   :  { %s2304_s7 = scalar_lea.vmem %s127_s1, 256  ;;  %p2309_p0 = scmp.lt.s32.totalorder %s127_s1, %s127_s1 }
  0x57   :  { %p2305_p13 = scmp.ne.s32.totalorder %s127_s1, %s2304_s7  ;;  %p2310_p1 = scmp.lt.s32.totalorder %s2304_s7, %s2304_s7 }
  0x59   :  { %p2311_p2 = por %p2310_p1, %p2309_p0 }
  0x5b   :  { %p2312_p3 = pnand %p2311_p2, %p2305_p13 }
  0x5d   :  { %2315 = shalt.err (!%p2312_p3)
}
  0x5e   :  { %s3266_s25 = smov 64   ;;  %s2586_s18 = smov 4  }
  0x5f   :  { %132 = dma.hbm_to_vmem [thread:$0]  %s3245_s10, 256, %s127_s1, [#allocation15], %s3266_s25, %s3266_s25, %s2586_s18  }
  0x60   :  { %s2316_s23 = scalar_lea.hbm %s3247_s12, 128 }
  0x61   :  { %p2317_p4 = scmp.ne.s32.totalorder %s3247_s12, %s2316_s23  ;;  %p2320_p5 = scmp.lt.u32.totalorder %s2316_s23, %s3247_s12 }
  0x63   :  { %p2322_p6 = pnand %p2320_p5, %p2317_p4 }
  0x65   :  { %2325 = shalt.err (!%p2322_p6)
}
  0x66   :  { %s2326_s29 = scalar_lea.vmem %s149_s0, 128  ;;  %p2331_p8 = scmp.lt.s32.totalorder %s149_s0, %s149_s0 }
  0x67   :  { %p2327_p7 = scmp.ne.s32.totalorder %s149_s0, %s2326_s29  ;;  %p2332_p9 = scmp.lt.s32.totalorder %s2326_s29, %s2326_s29 }
  0x69   :  { %p2333_p10 = por %p2332_p9, %p2331_p8 }
  0x6b   :  { %p2334_p11 = pnand %p2333_p10, %p2327_p7 }
  0x6d   :  { %2337 = shalt.err (!%p2334_p11)
}
  0x6e   :  { %154 = dma.hbm_to_vmem [thread:$0]  %s3247_s12, 128, %s149_s0, [#allocation18], %s3266_s25, %s3266_s25, %s2586_s18  }
  0x6f   :  { %s2587_s21 = smov [#allocation2]   ;;  %s2588_s7 = smov [#allocation7]  }
  0x70   :  { %s40_s30 = sshll.u32 %s2587_s21, 4  ;;  %s64_s24 = sshll.u32 %s2588_s7, 4  ;;  %s41_s30 = int_to_ptr.vmem [resolvable:$true] %s40_s30  ;;  %s65_s24 = int_to_ptr.vmem [resolvable:$true] %s64_s24 }
  0x71   :  { %s3276_s3 = sld [smem:[#allocation35_spill]] }
  0x77   :  { %s2338_s23 = scalar_lea.hbm %s3276_s3, 128 }
  0x78   :  { %p2339_p12 = scmp.ne.s32.totalorder %s3276_s3, %s2338_s23  ;;  %p2342_p13 = scmp.lt.u32.totalorder %s2338_s23, %s3276_s3 }
  0x7a   :  { %p2344_p0 = pnand %p2342_p13, %p2339_p12 }
  0x7c   :  { %2347 = shalt.err (!%p2344_p0)
}
  0x7d   :  { %s2348_s12 = scalar_lea.vmem %s41_s30, 128  ;;  %p2353_p2 = scmp.lt.s32.totalorder %s41_s30, %s41_s30 }
  0x7e   :  { %p2349_p1 = scmp.ne.s32.totalorder %s41_s30, %s2348_s12  ;;  %p2354_p3 = scmp.lt.s32.totalorder %s2348_s12, %s2348_s12 }
  0x80   :  { %p2355_p4 = por %p2354_p3, %p2353_p2 }
  0x82   :  { %p2356_p5 = pnand %p2355_p4, %p2349_p1 }
  0x84   :  { %2359 = shalt.err (!%p2356_p5)
}
  0x85   :  { %s3277_s0 = smov 2   ;;  %s3278_s29 = smov 32  }
  0x86   :  { %46 = dma.hbm_to_vmem [thread:$0]  %s3276_s3, 128, %s41_s30, [#allocation3], %s3278_s29, %s3278_s29, %s3277_s0  }
  0x87   :  { %s3279_s26 = sld [smem:[#allocation37_spill]] }
  0x8d   :  { %s2360_s22 = scalar_lea.hbm %s3279_s26, 64 }
  0x8e   :  { %p2361_p6 = scmp.ne.s32.totalorder %s3279_s26, %s2360_s22  ;;  %p2364_p7 = scmp.lt.u32.totalorder %s2360_s22, %s3279_s26 }
  0x90   :  { %p2366_p8 = pnand %p2364_p7, %p2361_p6 }
  0x92   :  { %2369 = shalt.err (!%p2366_p8)
}
  0x93   :  { %s2370_s4 = scalar_lea.vmem %s65_s24, 64  ;;  %p2375_p10 = scmp.lt.s32.totalorder %s65_s24, %s65_s24 }
  0x94   :  { %p2371_p9 = scmp.ne.s32.totalorder %s65_s24, %s2370_s4  ;;  %p2376_p11 = scmp.lt.s32.totalorder %s2370_s4, %s2370_s4 }
  0x96   :  { %p2377_p12 = por %p2376_p11, %p2375_p10 }
  0x98   :  { %p2378_p13 = pnand %p2377_p12, %p2371_p9 }
  0x9a   :  { %2381 = shalt.err (!%p2378_p13)
}
  0x9b   :  { %70 = dma.hbm_to_vmem [thread:$0]  %s3279_s26, 64, %s65_s24, [#allocation6], %s3278_s29, %s3278_s29, %s3277_s0  }
  0x9c   :  { %s2589_s12 = smov [#allocation10]   ;;  %s2590_s1 = smov [#allocation13]  }
  0x9d   :  { %s88_s10 = sshll.u32 %s2589_s12, 4  ;;  %s115_s21 = sshll.u32 %s2590_s1, 4  ;;  %s89_s10 = int_to_ptr.vmem [resolvable:$true] %s88_s10  ;;  %s116_s21 = int_to_ptr.vmem [resolvable:$true] %s115_s21 }
  0x9e   :  { %s3280_s23 = sld [smem:[#allocation39_spill]] }
  0xa4   :  { %s2382_s2 = scalar_lea.hbm %s3280_s23, 256 }
  0xa5   :  { %p2383_p0 = scmp.ne.s32.totalorder %s3280_s23, %s2382_s2  ;;  %p2386_p1 = scmp.lt.u32.totalorder %s2382_s2, %s3280_s23 }
  0xa7   :  { %p2388_p2 = pnand %p2386_p1, %p2383_p0 }
  0xa9   :  { %2391 = shalt.err (!%p2388_p2)
}
  0xaa   :  { %s2392_s24 = scalar_lea.vmem %s89_s10, 256  ;;  %p2397_p4 = scmp.lt.s32.totalorder %s89_s10, %s89_s10 }
  0xab   :  { %p2393_p3 = scmp.ne.s32.totalorder %s89_s10, %s2392_s24  ;;  %p2398_p5 = scmp.lt.s32.totalorder %s2392_s24, %s2392_s24 }
  0xad   :  { %p2399_p6 = por %p2398_p5, %p2397_p4 }
  0xaf   :  { %p2400_p7 = pnand %p2399_p6, %p2393_p3 }
  0xb1   :  { %2403 = shalt.err (!%p2400_p7)
}
  0xb2   :  { %s3281_s26 = smov 64   ;;  %s2404_s1 = scalar_lea.hbm %s3243_s8, 16 }
  0xb3   :  { %94 = dma.hbm_to_vmem [thread:$0]  %s3280_s23, 256, %s89_s10, [#allocation9], %s3281_s26, %s3281_s26, %s2586_s18  }
  0xb4   :  { %p2405_p8 = scmp.ne.s32.totalorder %s3243_s8, %s2404_s1  ;;  %p2408_p9 = scmp.lt.u32.totalorder %s2404_s1, %s3243_s8 }
  0xb6   :  { %p2410_p10 = pnand %p2408_p9, %p2405_p8 }
  0xb8   :  { %2413 = shalt.err (!%p2410_p10)
}
  0xb9   :  { %s2414_s28 = scalar_lea.vmem %s116_s21, 16  ;;  %s2418_s4 = scalar_lea.vmem %s116_s21, 32 }
  0xba   :  { %p2415_p11 = scmp.ne.s32.totalorder %s116_s21, %s2414_s28  ;;  %p2419_p12 = scmp.lt.s32.totalorder %s116_s21, %s116_s21 }
  0xbb   :  { %p2420_p13 = scmp.lt.s32.totalorder %s2418_s4, %s2414_s28 }
  0xbd   :  { %p2421_p0 = por %p2420_p13, %p2419_p12 }
  0xbf   :  { %p2422_p1 = pnand %p2421_p0, %p2415_p11 }
  0xc1   :  { %2425 = shalt.err (!%p2422_p1)
}
  0xc2   :  { %118 = dma.hbm_to_vmem [thread:$0]  %s3243_s8, 16, %s116_s21, [#allocation12]  }
  0xc3   :  { %s2591_s24 = smov [#allocation16]   ;;  %s2592_s3 = smov [#allocation19]  }
  0xc4   :  { %s139_s30 = sshll.u32 %s2591_s24, 4  ;;  %s164_s12 = sshll.u32 %s2592_s3, 4  ;;  %s140_s30 = int_to_ptr.vmem [resolvable:$true] %s139_s30  ;;  %s165_s12 = int_to_ptr.vmem [resolvable:$true] %s164_s12 }
  0xc5   :  { %s2426_s7 = scalar_lea.hbm %s3246_s11, 16 }
  0xc6   :  { %p2427_p2 = scmp.ne.s32.totalorder %s3246_s11, %s2426_s7  ;;  %p2430_p3 = scmp.lt.u32.totalorder %s2426_s7, %s3246_s11 }
  0xc8   :  { %p2432_p4 = pnand %p2430_p3, %p2427_p2 }
  0xca   :  { %2435 = shalt.err (!%p2432_p4)
}
  0xcb   :  { %s2436_s8 = scalar_lea.vmem %s140_s30, 16  ;;  %s2440_s21 = scalar_lea.vmem %s140_s30, 32 }
  0xcc   :  { %p2437_p5 = scmp.ne.s32.totalorder %s140_s30, %s2436_s8  ;;  %p2441_p6 = scmp.lt.s32.totalorder %s140_s30, %s140_s30 }
  0xcd   :  { %p2442_p7 = scmp.lt.s32.totalorder %s2440_s21, %s2436_s8 }
  0xcf   :  { %p2443_p8 = por %p2442_p7, %p2441_p6 }
  0xd1   :  { %p2444_p9 = pnand %p2443_p8, %p2437_p5 }
  0xd3   :  { %2447 = shalt.err (!%p2444_p9)
}
  0xd4   :  { %142 = dma.hbm_to_vmem [thread:$0]  %s3246_s11, 16, %s140_s30, [#allocation15]  }
  0xd5   :  { %s2448_s3 = scalar_lea.hbm %s3250_s15, 256 }
  0xd6   :  { %p2449_p10 = scmp.ne.s32.totalorder %s3250_s15, %s2448_s3  ;;  %p2452_p11 = scmp.lt.u32.totalorder %s2448_s3, %s3250_s15 }
  0xd8   :  { %p2454_p12 = pnand %p2452_p11, %p2449_p10 }
  0xda   :  { %2457 = shalt.err (!%p2454_p12)
}
  0xdb   :  { %s2458_s2 = scalar_lea.vmem %s165_s12, 256  ;;  %p2463_p0 = scmp.lt.s32.totalorder %s165_s12, %s165_s12 }
  0xdc   :  { %p2459_p13 = scmp.ne.s32.totalorder %s165_s12, %s2458_s2  ;;  %p2464_p1 = scmp.lt.s32.totalorder %s2458_s2, %s2458_s2 }
  0xde   :  { %p2465_p2 = por %p2464_p1, %p2463_p0 }
  0xe0   :  { %p2466_p3 = pnand %p2465_p2, %p2459_p13 }
  0xe2   :  { %2469 = shalt.err (!%p2466_p3)
}
  0xe3   :  { %170 = dma.hbm_to_vmem [thread:$0]  %s3250_s15, 256, %s165_s12, [#allocation18], %s3281_s26, %s3281_s26, %s2586_s18  }
  0xe4   :  { %s2593_s27 = smov [#allocation20]   ;;  %s2470_s4 = scalar_lea.hbm %s3251_s16, 256 }
  0xe5   :  { %s176_s28 = sshll.u32 %s2593_s27, 4  ;;  %p2471_p4 = scmp.ne.s32.totalorder %s3251_s16, %s2470_s4  ;;  %s177_s28 = int_to_ptr.vmem [resolvable:$true] %s176_s28 }
  0xe6   :  { %p2474_p5 = scmp.lt.u32.totalorder %s2470_s4, %s3251_s16 }
  0xe8   :  { %p2476_p6 = pnand %p2474_p5, %p2471_p4 }
  0xea   :  { %2479 = shalt.err (!%p2476_p6)
}
  0xeb   :  { %s2480_s25 = scalar_lea.vmem %s177_s28, 256  ;;  %p2485_p8 = scmp.lt.s32.totalorder %s177_s28, %s177_s28 }
  0xec   :  { %p2481_p7 = scmp.ne.s32.totalorder %s177_s28, %s2480_s25  ;;  %p2486_p9 = scmp.lt.s32.totalorder %s2480_s25, %s2480_s25 }
  0xee   :  { %p2487_p10 = por %p2486_p9, %p2485_p8 }
  0xf0   :  { %p2488_p11 = pnand %p2487_p10, %p2481_p7 }
  0xf2   :  { %2491 = shalt.err (!%p2488_p11)
}
  0xf3   :  { %182 = dma.hbm_to_vmem [thread:$0]  %s3251_s16, 256, %s177_s28, [#allocation21], %s3281_s26, %s3281_s26, %s2586_s18  }
  0xf4   :  { %2558 = dma.done.wait [#allocation3], 128  }
  0xf5   :  { %2559 = vsyncadd [#allocation3], 4294967168 }
  0xf6   :  { %2560 = dma.done.wait [#allocation6], 128  }
  0xf7   :  { %2561 = vsyncadd [#allocation6], 4294967168 }
  0xf8   :  { %2562 = dma.done.wait [#allocation9], 512  }
  0xf9   :  { %2563 = vsyncadd [#allocation9], 4294966784 }
  0xfa   :  { %2564 = dma.done.wait [#allocation12], 32  }
  0xfb   :  { %2565 = vsyncadd [#allocation12], 4294967264 }
  0xfc   :  { %2566 = dma.done.wait [#allocation15], 272  }
  0xfd   :  { %2567 = vsyncadd [#allocation15], 4294967024 }
  0xfe   :  { %2568 = dma.done.wait [#allocation18], 384  }
  0xff   :  { %2569 = vsyncadd [#allocation18], 4294966912 }
 0x100   :  { %2570 = dma.done.wait [#allocation21], 256  }
 0x101   :  { %2571 = vsyncadd [#allocation21], 4294967040  ;;  %v2594_v0 = vmov 0.0   ;;  %v2595_v1 = vmov 1983009808   ;;  %v253_v3 = vlaneseq  ;;  %vm2596_vm0 = vmmov 0  }
 0x102   :  { %1960 = vmatprep.subr.bf16.mxu1 %v2594_v0  ;;  %1954 = vmatprep.subr.bf16.mxu0 %v2594_v0  ;;  %v251_v2 = vunpack.c.l.s4 %v2595_v1  ;;  %v2895_v6 = vld [vmem:[%s3248_s13] sm:$0xff]   ;;  %v2130_v7 = vld [vmem:[#allocation17] sm:$0xff]   ;;  %v2901_v8 = vld [vmem:[%s3248_s13 + $0x8] sm:$0xff]   ;;  %vm279_vm1 = vcmask 130048   ;;  %vm364_vm2 = vcmask 261120   ;;  %vm1225_vm3 = vcmask 1040384  }
 0x103   :  { %1956 = vmatprep.mubr.msk.bf16.mxu0 %vm2596_vm0, %v2594_v0  ;;  %1964 = vmatprep.mubr.msk.bf16.mxu1 %vm2596_vm0, %v2594_v0  ;;  %v2890_v5 = vshrl.u32 %v253_v3, 7  ;;  %v222_v10 = vld [vmem:[#allocation2] sm:$0x3]  ;;  %v223_v11 = vld [vmem:[#allocation2 + $0x2] sm:$0x3]  ;;  %v2935_v47 = vld [vmem:[#allocation19] sm:$0xff]  }
 0x104   :  { %v252_v4 = vunpack.c.0.s8 %v251_v2  ;;  %1961 = vmatpush3.bf16.msra.mxu1 %v2895_v6  ;;  %1955 = vmatpush3.bf16.msra.mxu0 %v2130_v7  ;;  %v224_v12 = vld [vmem:[#allocation2 + $0x4] sm:$0x3]  ;;  %v225_v13 = vld [vmem:[#allocation2 + $0x6] sm:$0x3]  ;;  %v248_v14 = vcombine.low %v222_v10, %v223_v11  ;;  %v345_v15 = vld [vmem:[#allocation5] sm:$0x3] }
 0x105   :  { %1962 = vmatprep.subr.bf16.mxu1 %v2594_v0  ;;  %1968 = vmatprep.subr.bf16.mxu0 %v2594_v0  ;;  %v249_v16 = vcombine.low %v224_v12, %v225_v13  ;;  %v351_v17 = vpack.c.bf16 %v345_v15, %v345_v15  ;;  %v1851_v24 = vld [vmem:[%s3249_s14] ss:$0 sm:$0xff]  ;;  %v1858_v35 = vld.sshfl [vmem:[#allocation7] sm:$0x3 pattern:$0x76325410] }
 0x106   :  { %v2904_v9 = vsub.s32 %v252_v4, %v2890_v5  ;;  %v2933_v46 = vld [vmem:[#allocation20] sm:$0xff]   ;;  %v2938_v48 = vld [vmem:[#allocation20 + $0x8] sm:$0xff]   ;;  %v2942_v50 = vld [vmem:[#allocation19 + $0x8] sm:$0xff]   ;;  %vm1483_vm4 = vcmask 1041409   ;;  %vm1488_vm5 = vcmask 58368   ;;  %vm1553_vm6 = vcmask 1043456  }
 0x107   :  { %v347_v49 = vld [vmem:[#allocation5 + $0x2] sm:$0x3]  ;;  %v2977_v62 = vld [vmem:[%s3252_s17] ss:$0 sm:$0xff]  ;;  %vm1549_vm7 = vcmask 64512   ;;  %vm1157_vm8 = vcmask 254976  }
 0x108   :  { %1963 = vmatpush3.bf16.msra.mxu1 %v2901_v8  ;;  %v256_v18 = vrot.slane %v248_v14, %v2904_v9  ;;  %v263_v19 = vrot.slane %v249_v16, %v2904_v9  ;;  %v445_v51 = vpack.c.bf16 %v347_v49, %v347_v49 }
 0x109   :  { %1976 = vmatprep.subr.bf16.mxu1 %v2594_v0 }
 0x10a   :  { %v264_v20 = vcombine.low %v256_v18, %v263_v19  ;;  %v350_v18 = vld [vmem:[#allocation7 + $0x2] sm:$0x3] }
 0x10b   :  { %1965 = vmatmul.mubr.msk.bf16.vlgmr.msra.gmra.mrb[0].mxu1 %vm364_vm2, %v351_v17 }
 0x10c   :  { %1980 = vmatprep.mubr.msk.bf16.mxu1 %vm2596_vm0, %v2594_v0  ;;  %v266_v21 = vpack.c.bf16 %v264_v20, %v264_v20  ;;  %1977 = vmatpush3.bf16.msra.mxu1 %v2935_v47 }
 0x10d   :  { %1978 = vmatprep.subr.bf16.mxu1 %v2594_v0 }
 0x10e   :  { %1957 = vmatmul.mubr.msk.bf16.vlgmr.msra.gmra.mrb[0].mxu0 %vm279_vm1, %v266_v21 }
 0x10f   :  { %1972 = vmatprep.mubr.msk.bf16.mxu0 %vm2596_vm0, %v2594_v0  ;;  %1969 = vmatpush3.bf16.msra.mxu0 %v2933_v46 }
 0x110   :  { %1970 = vmatprep.subr.bf16.mxu0 %v2594_v0  ;;  %1979 = vmatpush3.bf16.msra.mxu1 %v2942_v50 }
 0x111   :  { %1992 = vmatprep.subr.bf16.mxu1 %v2594_v0 }
 0x113   :  { %1971 = vmatpush3.bf16.msra.mxu0 %v2938_v48 }
 0x114   :  { %1984 = vmatprep.subr.bf16.mxu0 %v2594_v0 }
 0x116   :  { %1973 = vmatmul.mubr.msk.bf16.vlgmr.msra.gmra.mrb[4].mxu0 %vm364_vm2, %v445_v51 }
 0x117   :  { %1985 = vmatpush3.bf16.msra.mxu0 %v2895_v6  ;;  %1988 = vmatprep.mubr.msk.bf16.mxu0 %vm2596_vm0, %v2594_v0 }
 0x118   :  { %1986 = vmatprep.subr.bf16.mxu0 %v2594_v0 }
 0x11b   :  { %1987 = vmatpush3.bf16.msra.mxu0 %v2901_v8 }
 0x11c   :  { %2000 = vmatprep.subr.bf16.mxu0 %v2594_v0 }
 0x1de   :  { %v402_v22 = vpop.f32.mrb[0].mxu1 }
 0x1df   :  { %v1966_v23 = vpop.f32.mrb[1].mxu1 }
 0x1e0   :  { %v405_v25 = vpop.f32.mrb[2].mxu1 }
 0x1e1   :  { %v1967_v26 = vpop.f32.mrb[3].mxu1  ;;  %v317_v27 = vpop.f32.mrb[0].mxu0 }
 0x1e2   :  { %v2920_v28 = vadd.f32 %v1851_v24, %v317_v27  ;;  %v1958_v29 = vpop.f32.mrb[1].mxu0 }
 0x1e3   :  { %v320_v30 = vpop.f32.mrb[2].mxu0 }
 0x1e4   :  { %v2924_v31 = vrot.slane %v2920_v28, %v2904_v9  ;;  %v1959_v32 = vpop.f32.mrb[3].mxu0 }
 0x1e6   :  { %v408_v33 = vadd.f32 %v402_v22, %v2924_v31  ;;  %v339_v61 = vcombine.high %v2924_v31, %v2924_v31 }
 0x1e8   :  { %2144 = vtanh.f32 %v408_v33  ;;  %v1857_v36 = vmul.f32 -1.442695, %v408_v33 }
 0x1e9   :  { %v495_v56 = vpop.f32.mrb[4].mxu0 }
 0x1ea   :  { %2146 = vpow2.f32 %v1857_v36  ;;  %v1974_v57 = vpop.f32.mrb[5].mxu0 }
 0x1eb   :  { %v498_v58 = vpop.f32.mrb[6].mxu0 }
 0x1ec   :  { %v1975_v59 = vpop.f32.mrb[7].mxu0 }
 0x1f2   :  { %v2145_v34 = vpop.eup %2144 }
 0x1f3   :  { %429 = vrot.lane.b32.xlu0 %v2145_v34, %s3281_s26 }
 0x1f4   :  { %v2147_v37 = vpop.eup %2146 }
 0x1f5   :  { %v412_v38 = vadd.f32 1.0, %v2147_v37 }
 0x1f7   :  { %424 = vrot.lane.b32.xlu0 %v1858_v35, %s3278_s29  ;;  %2148 = vrcp.f32 %v412_v38 }
 0x201   :  { %v2149_v39 = vpop.eup %2148 }
 0x265   :  { %v430_v40 = vpop.permute.xlu0 %429 }
 0x266   :  { %v432_v41 = vmul.f32 %v2149_v39, %v430_v40 }
 0x268   :  { %434 = vrot.lane.b32.xlu1 %v432_v41, %s3278_s29 }
 0x269   :  { %v425_v42 = vpop.permute.xlu0 %424 }
 0x26a   :  { %v427_v43 = vmul.f32 %v2149_v39, %v425_v42 }
 0x2da   :  { %v435_v44 = vpop.permute.xlu1 %434 }
 0x2db   :  { %v2930_v45 = vadd.f32 %v435_v44, %v427_v43 }
 0x2dd   :  { %2150 = vtanh.f32 %v2930_v45 }
 0x2e7   :  { %v2151_v52 = vpop.eup %2150 }
 0x2e8   :  { %440 = vrot.lane.b32.xlu1 %v2151_v52, %s3281_s26 }
 0x35a   :  { %v441_v53 = vpop.permute.xlu1 %440 }
 0x35b   :  { %v443_v54 = vmul.f32 %v2149_v39, %v441_v53 }
 0x35d   :  { %v444_v55 = vpack.c.bf16 %v443_v54, %v443_v54 }
 0x35f   :  { %502 = vrot.lane.b32.xlu0 %v444_v55, %s3278_s29 }
 0x3d1   :  { %v503_v60 = vpop.permute.xlu0 %502 }
 0x3d2   :  { %1981 = vmatmul.mubr.msk.bf16.vlgmr.msra.gmra.mrb[4].mxu1 %vm364_vm2, %v503_v60  ;;  %1989 = vmatmul.mubr.msk.bf16.vlgmr.msra.gmra.mrb[8].mxu0 %vm364_vm2, %v503_v60 }
 0x3d3   :  { %2001 = vmatpush3.bf16.msra.mxu0 %v2935_v47  ;;  %1993 = vmatpush3.bf16.msra.mxu1 %v2933_v46 }
 0x3d4   :  { %2002 = vmatprep.subr.bf16.mxu0 %v2594_v0  ;;  %1994 = vmatprep.subr.bf16.mxu1 %v2594_v0 }
 0x3d5   :  { %2004 = vmatprep.mubr.msk.bf16.mxu0 %vm2596_vm0, %v2594_v0  ;;  %1996 = vmatprep.mubr.msk.bf16.mxu1 %vm2596_vm0, %v2594_v0 }
 0x3d7   :  { %2003 = vmatpush3.bf16.msra.mxu0 %v2942_v50  ;;  %1995 = vmatpush3.bf16.msra.mxu1 %v2938_v48 }
 0x3d8   :  { %2008 = vmatprep.subr.bf16.mxu1 %v2594_v0  ;;  %2016 = vmatprep.subr.bf16.mxu0 %v2594_v0 }
 0x4a5   :  { %v553_v63 = vpop.f32.mrb[4].mxu1  ;;  %v628_v1 = vpop.f32.mrb[8].mxu0 }
 0x4a6   :  { %v554_v2 = vadd.f32 %v553_v63, %v495_v56  ;;  %v634_v4 = vadd.f32 %v628_v1, %v339_v61  ;;  %v1982_v7 = vpop.f32.mrb[5].mxu1  ;;  %v1990_v10 = vpop.f32.mrb[9].mxu0  ;;  %v324_v61 = vcombine.high %v2920_v28, %v2920_v28 }
 0x4a7   :  { %v556_v11 = vpop.f32.mrb[6].mxu1  ;;  %v631_v12 = vpop.f32.mrb[10].mxu0 }
 0x4a8   :  { %v565_v13 = vadd.f32 %v2977_v62, %v554_v2  ;;  %2152 = vtanh.f32 %v634_v4  ;;  %v1983_v14 = vpop.f32.mrb[7].mxu1  ;;  %v1991_v15 = vpop.f32.mrb[11].mxu0  ;;  %v1868_v19 = vmul.f32 -1.442695, %v634_v4  ;;  %v3021_v2 = vrot.slane %v324_v61, %v2904_v9 }
 0x4aa   :  { %2154 = vtanh.f32 %v565_v13  ;;  %v1866_v20 = vmul.f32 -1.442695, %v565_v13 }
 0x4ab   :  { %2156 = vpow2.f32 %v1868_v19 }
 0x4ac   :  { %2158 = vpow2.f32 %v1866_v20 }
 0x4b2   :  { %v2153_v16 = vpop.eup %2152 }
 0x4b3   :  { %644 = vrot.lane.b32.xlu0 %v2153_v16, %s3281_s26 }
 0x4b4   :  { %v2155_v17 = vpop.eup %2154 }
 0x4b5   :  { %579 = vrot.lane.b32.xlu1 %v2155_v17, %s3281_s26  ;;  %v2157_v21 = vpop.eup %2156 }
 0x4b6   :  { %v2159_v22 = vpop.eup %2158  ;;  %v638_v23 = vadd.f32 1.0, %v2157_v21 }
 0x4b7   :  { %v569_v24 = vadd.f32 1.0, %v2159_v22 }
 0x4b8   :  { %2160 = vrcp.f32 %v638_v23 }
 0x4b9   :  { %574 = vrot.lane.b32.xlu1 %v350_v18, %s3278_s29  ;;  %2162 = vrcp.f32 %v569_v24 }
 0x4c2   :  { %v2161_v25 = vpop.eup %2160 }
 0x4c3   :  { %v2163_v29 = vpop.eup %2162  ;;  %v642_v33 = vmul.f32 %v2161_v25, %v2930_v45 }
 0x525   :  { %v645_v26 = vpop.permute.xlu0 %644 }
 0x526   :  { %v647_v27 = vmul.f32 %v2161_v25, %v645_v26 }
 0x527   :  { %v580_v30 = vpop.permute.xlu1 %579 }
 0x528   :  { %v582_v31 = vmul.f32 %v2163_v29, %v580_v30  ;;  %649 = vrot.lane.b32.xlu1 %v647_v27, %s3278_s29 }
 0x52a   :  { %584 = vrot.lane.b32.xlu0 %v582_v31, %s3278_s29 }
 0x52b   :  { %v575_v32 = vpop.permute.xlu1 %574 }
 0x52c   :  { %v577_v35 = vmul.f32 %v2163_v29, %v575_v32 }
 0x59a   :  { %v650_v34 = vpop.permute.xlu1 %649 }
 0x59b   :  { %v2986_v36 = vadd.f32 %v650_v34, %v642_v33 }
 0x59c   :  { %v585_v37 = vpop.permute.xlu0 %584 }
 0x59d   :  { %2164 = vtanh.f32 %v2986_v36  ;;  %v2989_v38 = vadd.f32 %v585_v37, %v577_v35 }
 0x59f   :  { %2166 = vtanh.f32 %v2989_v38 }
 0x5a7   :  { %v2165_v39 = vpop.eup %2164 }
 0x5a8   :  { %655 = vrot.lane.b32.xlu1 %v2165_v39, %s3281_s26 }
 0x5a9   :  { %v2167_v40 = vpop.eup %2166 }
 0x5aa   :  { %590 = vrot.lane.b32.xlu0 %v2167_v40, %s3281_s26 }
 0x61a   :  { %v656_v41 = vpop.permute.xlu1 %655 }
 0x61b   :  { %v658_v42 = vmul.f32 %v2161_v25, %v656_v41 }
 0x61c   :  { %v591_v43 = vpop.permute.xlu0 %590 }
 0x61d   :  { %v659_v44 = vpack.c.bf16 %v658_v42, %v658_v42  ;;  %v593_v45 = vmul.f32 %v2163_v29, %v591_v43 }
 0x61f   :  { %v660_v49 = vpack.c.bf16 %v593_v45, %v593_v45  ;;  %708 = vrot.lane.b32.xlu1 %v659_v44, %s3278_s29 }
 0x621   :  { %662 = vrot.lane.b32.xlu0 %v660_v49, %s3278_s29  ;;  %v340_v49 = vcombine.high %v3021_v2, %v3021_v2 }
 0x691   :  { %v709_v51 = vpop.permute.xlu1 %708 }
 0x692   :  { %2005 = vmatmul.mubr.msk.bf16.vlgmr.msra.gmra.mrb[12].mxu0 %vm364_vm2, %v709_v51 }
 0x693   :  { %v663_v52 = vpop.permute.xlu0 %662  ;;  %2017 = vmatpush3.bf16.msra.mxu0 %v2933_v46  ;;  %2020 = vmatprep.mubr.msk.bf16.mxu0 %vm2596_vm0, %v2594_v0 }
 0x694   :  { %1997 = vmatmul.mubr.msk.bf16.vlgmr.msra.gmra.mrb[8].mxu1 %vm364_vm2, %v663_v52  ;;  %2018 = vmatprep.subr.bf16.mxu0 %v2594_v0 }
 0x695   :  { %2009 = vmatpush3.bf16.msra.mxu1 %v2895_v6  ;;  %2012 = vmatprep.mubr.msk.bf16.mxu1 %vm2596_vm0, %v2594_v0 }
 0x696   :  { %2010 = vmatprep.subr.bf16.mxu1 %v2594_v0 }
 0x697   :  { %2019 = vmatpush3.bf16.msra.mxu0 %v2938_v48 }
 0x698   :  { %2032 = vmatprep.subr.bf16.mxu0 %v2594_v0 }
 0x699   :  { %2011 = vmatpush3.bf16.msra.mxu1 %v2901_v8 }
 0x69a   :  { %2024 = vmatprep.subr.bf16.mxu1 %v2594_v0 }
 0x69c   :  { %2013 = vmatmul.mubr.msk.bf16.vlgmr.msra.gmra.mrb[12].mxu1 %vm364_vm2, %v709_v51 }
 0x69d   :  { %2025 = vmatpush3.bf16.msra.mxu1 %v2935_v47  ;;  %2028 = vmatprep.mubr.msk.bf16.mxu1 %vm2596_vm0, %v2594_v0 }
 0x69e   :  { %2026 = vmatprep.subr.bf16.mxu1 %v2594_v0 }
 0x6a1   :  { %2027 = vmatpush3.bf16.msra.mxu1 %v2942_v50 }
 0x6a2   :  { %2040 = vmatprep.subr.bf16.mxu1 %v2594_v0 }
 0x765   :  { %v747_v53 = vpop.f32.mrb[12].mxu0 }
 0x766   :  { %v2006_v54 = vpop.f32.mrb[13].mxu0 }
 0x767   :  { %v701_v55 = vpop.f32.mrb[8].mxu1  ;;  %v750_v56 = vpop.f32.mrb[14].mxu0 }
 0x768   :  { %v748_v57 = vadd.f32 %v747_v53, %v701_v55  ;;  %v1998_v58 = vpop.f32.mrb[9].mxu1  ;;  %v2007_v59 = vpop.f32.mrb[15].mxu0 }
 0x769   :  { %v704_v60 = vpop.f32.mrb[10].mxu1 }
 0x76a   :  { %v753_v63 = vadd.f32 %v2977_v62, %v748_v57  ;;  %v1999_v1 = vpop.f32.mrb[11].mxu1 }
 0x76c   :  { %2168 = vtanh.f32 %v753_v63  ;;  %v1871_v28 = vmul.f32 -1.442695, %v753_v63 }
 0x76f   :  { %v812_v4 = vpop.f32.mrb[12].mxu1 }
 0x770   :  { %v818_v7 = vadd.f32 %v812_v4, %v3021_v2  ;;  %v2014_v10 = vpop.f32.mrb[13].mxu1 }
 0x771   :  { %v815_v11 = vpop.f32.mrb[14].mxu1 }
 0x772   :  { %2170 = vtanh.f32 %v818_v7  ;;  %v2015_v12 = vpop.f32.mrb[15].mxu1  ;;  %v1873_v15 = vmul.f32 -1.442695, %v818_v7 }
 0x773   :  { %2172 = vpow2.f32 %v1871_v28 }
 0x774   :  { %2174 = vpow2.f32 %v1873_v15 }
 0x776   :  { %v2169_v13 = vpop.eup %2168 }
 0x777   :  { %763 = vrot.lane.b32.xlu0 %v2169_v13, %s3281_s26 }
 0x77c   :  { %v2171_v14 = vpop.eup %2170 }
 0x77d   :  { %828 = vrot.lane.b32.xlu1 %v2171_v14, %s3281_s26  ;;  %v2173_v16 = vpop.eup %2172 }
 0x77e   :  { %v757_v17 = vadd.f32 1.0, %v2173_v16  ;;  %v2175_v18 = vpop.eup %2174 }
 0x77f   :  { %v822_v19 = vadd.f32 1.0, %v2175_v18 }
 0x780   :  { %2176 = vrcp.f32 %v757_v17 }
 0x781   :  { %2178 = vrcp.f32 %v822_v19 }
 0x78a   :  { %v2177_v20 = vpop.eup %2176 }
 0x78b   :  { %v2179_v23 = vpop.eup %2178  ;;  %v761_v26 = vmul.f32 %v2177_v20, %v2989_v38 }
 0x78c   :  { %v826_v30 = vmul.f32 %v2179_v23, %v2986_v36 }
 0x7e9   :  { %v764_v21 = vpop.permute.xlu0 %763 }
 0x7ea   :  { %v766_v22 = vmul.f32 %v2177_v20, %v764_v21 }
 0x7ec   :  { %768 = vrot.lane.b32.xlu0 %v766_v22, %s3278_s29 }
 0x7ef   :  { %v829_v24 = vpop.permute.xlu1 %828 }
 0x7f0   :  { %v831_v25 = vmul.f32 %v2179_v23, %v829_v24 }
 0x7f2   :  { %833 = vrot.lane.b32.xlu1 %v831_v25, %s3278_s29 }
 0x85e   :  { %v769_v27 = vpop.permute.xlu0 %768 }
 0x85f   :  { %v3029_v29 = vadd.f32 %v769_v27, %v761_v26 }
 0x861   :  { %2180 = vtanh.f32 %v3029_v29 }
 0x864   :  { %v834_v31 = vpop.permute.xlu1 %833 }
 0x865   :  { %v3033_v32 = vadd.f32 %v834_v31, %v826_v30 }
 0x867   :  { %2182 = vtanh.f32 %v3033_v32 }
 0x86b   :  { %v2181_v33 = vpop.eup %2180 }
 0x86c   :  { %774 = vrot.lane.b32.xlu0 %v2181_v33, %s3281_s26 }
 0x871   :  { %v2183_v34 = vpop.eup %2182 }
 0x872   :  { %839 = vrot.lane.b32.xlu1 %v2183_v34, %s3281_s26 }
 0x8de   :  { %v775_v35 = vpop.permute.xlu0 %774 }
 0x8df   :  { %v777_v37 = vmul.f32 %v2177_v20, %v775_v35 }
 0x8e1   :  { %v844_v38 = vpack.c.bf16 %v777_v37, %v777_v37 }
 0x8e3   :  { %846 = vrot.lane.b32.xlu0 %v844_v38, %s3278_s29 }
 0x8e4   :  { %v840_v39 = vpop.permute.xlu1 %839 }
 0x8e5   :  { %v842_v40 = vmul.f32 %v2179_v23, %v840_v39 }
 0x8e7   :  { %v843_v41 = vpack.c.bf16 %v842_v40, %v842_v40 }
 0x8e9   :  { %892 = vrot.lane.b32.xlu1 %v843_v41, %s3278_s29 }
 0x955   :  { %v847_v36 = vpop.permute.xlu0 %846 }
 0x956   :  { %2021 = vmatmul.mubr.msk.bf16.vlgmr.msra.gmra.mrb[16].mxu0 %vm364_vm2, %v847_v36 }
 0x957   :  { %2033 = vmatpush3.bf16.msra.mxu0 %v2895_v6  ;;  %2036 = vmatprep.mubr.msk.bf16.mxu0 %vm2596_vm0, %v2594_v0 }
 0x958   :  { %2034 = vmatprep.subr.bf16.mxu0 %v2594_v0 }
 0x95b   :  { %2035 = vmatpush3.bf16.msra.mxu0 %v2901_v8  ;;  %v893_v42 = vpop.permute.xlu1 %892 }
 0x95c   :  { %2029 = vmatmul.mubr.msk.bf16.vlgmr.msra.gmra.mrb[16].mxu1 %vm364_vm2, %v893_v42  ;;  %2048 = vmatprep.subr.bf16.mxu0 %v2594_v0 }
 0x95d   :  { %2041 = vmatpush3.bf16.msra.mxu1 %v2933_v46  ;;  %2044 = vmatprep.mubr.msk.bf16.mxu1 %vm2596_vm0, %v2594_v0 }
 0x95e   :  { %2037 = vmatmul.mubr.msk.bf16.vlgmr.msra.gmra.mrb[20].mxu0 %vm364_vm2, %v893_v42  ;;  %2042 = vmatprep.subr.bf16.mxu1 %v2594_v0 }
 0x95f   :  { %2049 = vmatpush3.bf16.msra.mxu0 %v2935_v47  ;;  %2052 = vmatprep.mubr.msk.bf16.mxu0 %vm2596_vm0, %v2594_v0 }
 0x960   :  { %2050 = vmatprep.subr.bf16.mxu0 %v2594_v0 }
 0x961   :  { %2043 = vmatpush3.bf16.msra.mxu1 %v2938_v48 }
 0x962   :  { %2056 = vmatprep.subr.bf16.mxu1 %v2594_v0 }
 0x963   :  { %2051 = vmatpush3.bf16.msra.mxu0 %v2942_v50 }
 0x964   :  { %2064 = vmatprep.subr.bf16.mxu0 %v2594_v0 }
 0xa29   :  { %v885_v6 = vpop.f32.mrb[16].mxu0 }
 0xa2a   :  { %v2022_v8 = vpop.f32.mrb[17].mxu0 }
 0xa2b   :  { %v888_v46 = vpop.f32.mrb[18].mxu0 }
 0xa2c   :  { %v2023_v43 = vpop.f32.mrb[19].mxu0 }
 0xa2f   :  { %v931_v44 = vpop.f32.mrb[16].mxu1 }
 0xa30   :  { %v932_v45 = vadd.f32 %v931_v44, %v885_v6  ;;  %v2030_v47 = vpop.f32.mrb[17].mxu1 }
 0xa31   :  { %v934_v51 = vpop.f32.mrb[18].mxu1  ;;  %v996_v52 = vpop.f32.mrb[20].mxu0 }
 0xa32   :  { %v937_v48 = vadd.f32 %v2977_v62, %v932_v45  ;;  %v1002_v53 = vadd.f32 %v996_v52, %v340_v49  ;;  %v2031_v54 = vpop.f32.mrb[19].mxu1  ;;  %v2038_v55 = vpop.f32.mrb[21].mxu0  ;;  %v2136_v49 = vld [vmem:[#allocation10] sm:$0xff]   ;;  %v2138_v51 = vld [vmem:[%s3241_s6] sm:$0xff]   ;;  %v2137_v52 = vld [vmem:[#allocation10 + $0x8] sm:$0xff]  }
 0xa33   :  { %v999_v50 = vpop.f32.mrb[22].mxu0 }
 0xa34   :  { %2184 = vtanh.f32 %v937_v48  ;;  %v2039_v56 = vpop.f32.mrb[23].mxu0  ;;  %v1876_v59 = vmul.f32 -1.442695, %v937_v48  ;;  %v1878_v60 = vmul.f32 -1.442695, %v1002_v53 }
 0xa35   :  { %2186 = vtanh.f32 %v1002_v53  ;;  %v2597_v48 = vmov 1966171168  }
 0xa36   :  { %2188 = vpow2.f32 %v1876_v59  ;;  %v1184_v53 = vunpack.c.l.s4 %v2597_v48  ;;  %v2139_v59 = vld [vmem:[%s3241_s6 + $0x8] sm:$0xff]  }
 0xa37   :  { %2190 = vpow2.f32 %v1878_v60 }
 0xa38   :  { %v1185_v54 = vunpack.c.0.s8 %v1184_v53 }
 0xa3a   :  { %v1188_v50 = vsub.s32 %v1185_v54, %v2890_v5 }
 0xa3e   :  { %v2185_v57 = vpop.eup %2184 }
 0xa3f   :  { %v2187_v58 = vpop.eup %2186  ;;  %947 = vrot.lane.b32.xlu0 %v2185_v57, %s3281_s26  ;;  %v3104_v57 = vsub.s32 0, %v2890_v5 }
 0xa40   :  { %1012 = vrot.lane.b32.xlu1 %v2187_v58, %s3281_s26  ;;  %v2189_v61 = vpop.eup %2188 }
 0xa41   :  { %v2191_v63 = vpop.eup %2190  ;;  %v941_v1 = vadd.f32 1.0, %v2189_v61 }
 0xa42   :  { %v1006_v2 = vadd.f32 1.0, %v2191_v63 }
 0xa43   :  { %2192 = vrcp.f32 %v941_v1  ;;  %v3111_v1 = vld [vmem:[#allocation8] sm:$0xff] }
 0xa44   :  { %2194 = vrcp.f32 %v1006_v2  ;;  %v3113_v2 = vld [vmem:[#allocation8 + $0x8] sm:$0xff] }
 0xa4d   :  { %v2193_v4 = vpop.eup %2192 }
 0xa4e   :  { %v2195_v10 = vpop.eup %2194  ;;  %v945_v14 = vmul.f32 %v2193_v4, %v3029_v29 }
 0xa4f   :  { %v1010_v15 = vmul.f32 %v2195_v10, %v3033_v32 }
 0xab1   :  { %v948_v7 = vpop.permute.xlu0 %947 }
 0xab2   :  { %v950_v11 = vmul.f32 %v2193_v4, %v948_v7  ;;  %v1013_v12 = vpop.permute.xlu1 %1012 }
 0xab3   :  { %v1015_v13 = vmul.f32 %v2195_v10, %v1013_v12 }
 0xab4   :  { %952 = vrot.lane.b32.xlu0 %v950_v11, %s3278_s29 }
 0xab5   :  { %1017 = vrot.lane.b32.xlu1 %v1015_v13, %s3278_s29 }
 0xb26   :  { %v953_v28 = vpop.permute.xlu0 %952 }
 0xb27   :  { %v955_v16 = vadd.f32 %v953_v28, %v945_v14  ;;  %v1018_v17 = vpop.permute.xlu1 %1017 }
 0xb28   :  { %v3070_v18 = vadd.f32 %v1018_v17, %v1010_v15 }
 0xb29   :  { %2196 = vtanh.f32 %v955_v16 }
 0xb2a   :  { %2198 = vtanh.f32 %v3070_v18 }
 0xb33   :  { %v2197_v19 = vpop.eup %2196 }
 0xb34   :  { %v2199_v20 = vpop.eup %2198  ;;  %958 = vrot.lane.b32.xlu0 %v2197_v19, %s3281_s26 }
 0xb35   :  { %1023 = vrot.lane.b32.xlu1 %v2199_v20, %s3281_s26 }
 0xba6   :  { %v959_v21 = vpop.permute.xlu0 %958 }
 0xba7   :  { %v961_v22 = vmul.f32 %v2193_v4, %v959_v21  ;;  %v1024_v23 = vpop.permute.xlu1 %1023  ;;  %v1309_v4 = vpack.c.bf16 %v3113_v2, %v3111_v1 }
 0xba8   :  { %v3075_v24 = vmul.f32 %v2195_v10, %v1024_v23  ;;  %v1882_v23 = vld [vmem:[%s3240_s5] ss:$0 sm:$0xff]  ;;  %s2599_s5 = smov 96  }
 0xba9   :  { %v1028_v25 = vpack.c.bf16 %v961_v22, %v961_v22 }
 0xbaa   :  { %v1027_v26 = vpack.c.bf16 %v3075_v24, %v3075_v24  ;;  %v1189_v60 = vrot.slane %v3075_v24, %v1188_v50 }
 0xbab   :  { %1030 = vrot.lane.b32.xlu0 %v1028_v25, %s3278_s29 }
 0xbac   :  { %1076 = vrot.lane.b32.xlu1 %v1027_v26, %s3278_s29  ;;  %v1190_v11 = vcombine.high %v1189_v60, %v1189_v60 }
 0xc1d   :  { %v1031_v27 = vpop.permute.xlu0 %1030 }
 0xc1e   :  { %v1077_v29 = vpop.permute.xlu1 %1076  ;;  %2045 = vmatmul.mubr.msk.bf16.vlgmr.msra.gmra.mrb[20].mxu1 %vm364_vm2, %v1031_v27 }
 0xc1f   :  { %2053 = vmatmul.mubr.msk.bf16.vlgmr.msra.gmra.mrb[24].mxu0 %vm364_vm2, %v1077_v29  ;;  %2060 = vmatprep.mubr.msk.bf16.mxu1 %vm2596_vm0, %v2594_v0 }
 0xc20   :  { %2068 = vmatprep.mubr.msk.bf16.mxu0 %vm2596_vm0, %v2594_v0  ;;  %2057 = vmatpush3.bf16.msra.mxu1 %v2136_v49 }
 0xc21   :  { %2065 = vmatpush3.bf16.msra.mxu0 %v2138_v51  ;;  %2058 = vmatprep.subr.bf16.mxu1 %v2594_v0 }
 0xc22   :  { %2066 = vmatprep.subr.bf16.mxu0 %v2594_v0 }
 0xc24   :  { %2059 = vmatpush3.bf16.msra.mxu1 %v2137_v52 }
 0xc25   :  { %2072 = vmatprep.subr.bf16.mxu1 %v2594_v0  ;;  %2067 = vmatpush3.bf16.msra.mxu0 %v2139_v59 }
 0xc26   :  { %2078 = vmatprep.subr.bf16.mxu0 %v2594_v0 }
 0xc28   :  { %2069 = vmatmul.mubr.msk.bf16.vlgmr.msra.gmra.mrb[28].mxu0 %vm364_vm2, %v1309_v4 }
 0xc29   :  { %2080 = vmatprep.mubr.msk.bf16.mxu0 %vm2596_vm0, %v2594_v0 }
 0xcf1   :  { %v1069_v30 = vpop.f32.mrb[20].mxu1 }
 0xcf2   :  { %v1115_v31 = vpop.f32.mrb[24].mxu0  ;;  %v2046_v32 = vpop.f32.mrb[21].mxu1 }
 0xcf3   :  { %v1116_v33 = vadd.f32 %v1115_v31, %v1069_v30  ;;  %v2054_v34 = vpop.f32.mrb[25].mxu0  ;;  %v1072_v35 = vpop.f32.mrb[22].mxu1  ;;  %v1886_v30 = vld [vmem:[#allocation11] ss:$0 sm:$0xff] }
 0xcf4   :  { %v1118_v37 = vpop.f32.mrb[26].mxu0  ;;  %v2047_v38 = vpop.f32.mrb[23].mxu1 }
 0xcf5   :  { %v1121_v39 = vadd.f32 %v2977_v62, %v1116_v33  ;;  %v2055_v40 = vpop.f32.mrb[27].mxu0 }
 0xcf7   :  { %2200 = vtanh.f32 %v1121_v39  ;;  %v1881_v36 = vmul.f32 -1.442695, %v1121_v39 }
 0xcf9   :  { %2202 = vpow2.f32 %v1881_v36 }
 0xcfb   :  { %v1370_v19 = vpop.f32.mrb[28].mxu0 }
 0xcfc   :  { %v2070_v20 = vpop.f32.mrb[29].mxu0  ;;  %v1371_v35 = vadd.f32 %v1886_v30, %v1370_v19 }
 0xcfd   :  { %v1373_v21 = vpop.f32.mrb[30].mxu0 }
 0xcfe   :  { %v2071_v22 = vpop.f32.mrb[31].mxu0  ;;  %v1374_v40 = vadd.f32 %v1886_v30, %v1373_v21  ;;  %v2598_v30 = vmov 0  }
 0xcff   :  { %2128 = vset.pattern.permute.xlu0 %v2598_v30  ;;  %2127 = vset.pattern.permute.xlu1 %v2598_v30 }
 0xd01   :  { %v2201_v41 = vpop.eup %2200 }
 0xd02   :  { %1131 = vrot.lane.b32.xlu0 %v2201_v41, %s3281_s26 }
 0xd03   :  { %v2203_v42 = vpop.eup %2202 }
 0xd04   :  { %v1125_v6 = vadd.f32 1.0, %v2203_v42 }
 0xd06   :  { %2204 = vrcp.f32 %v1125_v6 }
 0xd10   :  { %v2205_v8 = vpop.eup %2204 }
 0xd11   :  { %v1129_v44 = vmul.f32 %v2205_v8, %v955_v16 }
 0xd74   :  { %v1132_v46 = vpop.permute.xlu0 %1131 }
 0xd75   :  { %v1134_v43 = vmul.f32 %v2205_v8, %v1132_v46 }
 0xd77   :  { %1136 = vrot.lane.b32.xlu1 %v1134_v43, %s3278_s29 }
 0xde9   :  { %v1137_v45 = vpop.permute.xlu1 %1136 }
 0xdea   :  { %v3090_v47 = vadd.f32 %v1137_v45, %v1129_v44  ;;  %v1890_v45 = vld [vmem:[#allocation13] ss:$0 sm:$0xff] }
 0xdec   :  { %2206 = vtanh.f32 %v3090_v47 }
 0xdf6   :  { %v2207_v62 = vpop.eup %2206 }
 0xdf7   :  { %1142 = vrot.lane.b32.xlu0 %v2207_v62, %s3281_s26 }
 0xe69   :  { %v1143_v55 = vpop.permute.xlu0 %1142 }
 0xe6a   :  { %v3101_v56 = vmul.f32 %v2205_v8, %v1143_v55 }
 0xe6c   :  { %v1199_v58 = vrot.slane %v3101_v56, %v1188_v50 }
 0xe6e   :  { %v1200_v61 = vcombine.high %v1199_v58, %v1199_v58  ;;  %v1207_v63 = vrot.slane %v1199_v58, %v1188_v50 }
 0xe70   :  { %v1214_v7 = vrot.slane %v1200_v61, %v1188_v50  ;;  %v1218_v10 = vrot.slane %v1207_v63, %v3104_v57 }
 0xe72   :  { %v1222_v12 = vrot.slane %v1214_v7, %v3104_v57  ;;  %v1226_v13 = vsel %vm1225_vm3, %v1189_v60, %v1218_v10 }
 0xe74   :  { %v1227_v14 = vsel %vm1225_vm3, %v1190_v11, %v1222_v12 }
 0xe75   :  { %v1230_v28 = vcombine.low %v1226_v13, %v1227_v14  ;;  %v1466_v13 = vand.u32 127, %v253_v3 }
 0xe77   :  { %v1237_v15 = vrot.slane %v1230_v28, %v2904_v9  ;;  %v3144_v28 = vsub.s32 %v1466_v13, %v2890_v5  ;;  %v2142_v13 = vld [vmem:[%s3244_s9] sm:$0xff]  }
 0xe79   :  { %v1239_v16 = vpack.c.bf16 %v1237_v15, %v1237_v15 }
 0xe7b   :  { %1252 = vrot.lane.b32.xlu1 %v1239_v16, %s3278_s29 }
 0xeed   :  { %v3125_v17 = vpop.permute.xlu1 %1252 }
 0xeee   :  { %2061 = vmatmul.mubr.msk.bf16.vlgmr.msra.gmra.mrb[24].mxu1 %vm364_vm2, %v3125_v17 }
 0xeef   :  { %2074 = vmatprep.mubr.msk.bf16.mxu1 %vm2596_vm0, %v2594_v0 }
 0xfc1   :  { %v1303_v25 = vpop.f32.mrb[24].mxu1 }
 0xfc2   :  { %v1304_v26 = vadd.f32 %v1882_v23, %v1303_v25  ;;  %v2062_v27 = vpop.f32.mrb[25].mxu1 }
 0xfc3   :  { %v1306_v29 = vpop.f32.mrb[26].mxu1 }
 0xfc4   :  { %v1384_v31 = vrot.slane %v1304_v26, %v1188_v50  ;;  %v2063_v32 = vpop.f32.mrb[27].mxu1 }
 0xfc6   :  { %v1385_v33 = vcombine.high %v1384_v31, %v1384_v31  ;;  %v1392_v34 = vrot.slane %v1384_v31, %v1188_v50 }
 0xfc8   :  { %v1399_v37 = vrot.slane %v1385_v33, %v1188_v50  ;;  %v1405_v38 = vrot.slane %v1392_v34, %v3104_v57  ;;  %v1400_v39 = vcombine.high %v1392_v34, %v1392_v34  ;;  %v1505_v33 = vsub.s32 1, %v2890_v5 }
 0xfc9   :  { %v1527_v5 = vpack.c.bf16 %v3111_v1, %v3111_v1  ;;  %v1153_v1 = vrot.slane %v3075_v24, %v2904_v9 }
 0xfca   :  { %v1409_v41 = vrot.slane %v1399_v37, %v3104_v57  ;;  %v1422_v36 = vadd.f32 %v1405_v38, %v1371_v35  ;;  %v1401_v42 = vcombine.high %v1399_v37, %v1399_v37  ;;  %v1413_v6 = vrot.slane %v1400_v39, %v3104_v57 }
 0xfcc   :  { %v1423_v8 = vadd.f32 %v1409_v41, %v1371_v35  ;;  %2208 = vtanh.f32 %v1422_v36  ;;  %v1417_v46 = vrot.slane %v1401_v42, %v3104_v57  ;;  %v1424_v43 = vadd.f32 %v1413_v6, %v1374_v40 }
 0xfce   :  { %2210 = vtanh.f32 %v1423_v8  ;;  %v1425_v44 = vadd.f32 %v1417_v46, %v1374_v40 }
 0xfcf   :  { %2212 = vtanh.f32 %v1424_v43 }
 0xfd0   :  { %2214 = vtanh.f32 %v1425_v44 }
 0xfd6   :  { %v2209_v62 = vpop.eup %2208 }
 0xfd7   :  { %v1437_v49 = vmul.f32 %v2209_v62, %v1890_v45  ;;  %v1555_v62 = vsel %vm1553_vm6, %v1527_v5, 0 }
 0xfd8   :  { %v2211_v51 = vpop.eup %2210  ;;  %2073 = vmatpush3.bf16.msra.mxu1 %v1555_v62 }
 0xfd9   :  { %v2213_v52 = vpop.eup %2212  ;;  %v1441_v48 = vsel %vm364_vm2, %v1437_v49, 0.0  ;;  %v1438_v53 = vmul.f32 %v2211_v51, %v1890_v45  ;;  %2084 = vmatprep.subr.bf16.mxu1 %v2594_v0 }
 0xfda   :  { %v2215_v54 = vpop.eup %2214  ;;  %1442 = vadd.xlane.f32.xlu0 %v1441_v48  ;;  %v1439_v55 = vmul.f32 %v2213_v52, %v1890_v45 }
 0xfdb   :  { %v1444_v50 = vsel %vm364_vm2, %v1438_v53, 0.0  ;;  %v1440_v59 = vmul.f32 %v2215_v54, %v1890_v45  ;;  %v1166_v53 = vrot.slane %v3070_v18, %v2904_v9  ;;  %v2141_v18 = vld [vmem:[#allocation14 + $0x8] sm:$0xff]  }
 0xfdc   :  { %1445 = vadd.xlane.f32.xlu1 %v1444_v50  ;;  %v1447_v58 = vsel %vm364_vm2, %v1439_v55, 0.0 }
 0xfdd   :  { %v1450_v60 = vsel %vm364_vm2, %v1440_v59, 0.0 }
 0xfde   :  { %1448 = vadd.xlane.f32.xlu0 %v1447_v58  ;;  %v2140_v58 = vld [vmem:[#allocation14] sm:$0xff]  }
 0xfe2   :  { %1451 = vadd.xlane.f32.xlu0 %v1450_v60 }
0x1067   :  { %v1443_v61 = vpop.xlane.xlu0 %1442 }
0x1068   :  { %v1453_v63 = vmul.f32 1.442695, %v1443_v61 }
0x1069   :  { %v1446_v4 = vpop.xlane.xlu1 %1445 }
0x106a   :  { %2216 = vpow2.f32 %v1453_v63  ;;  %v1455_v7 = vmul.f32 1.442695, %v1446_v4 }
0x106b   :  { %v1449_v10 = vpop.xlane.xlu0 %1448 }
0x106c   :  { %2218 = vpow2.f32 %v1455_v7  ;;  %v1457_v11 = vmul.f32 1.442695, %v1449_v10 }
0x106e   :  { %2220 = vpow2.f32 %v1457_v11 }
0x106f   :  { %v1452_v12 = vpop.xlane.xlu0 %1451 }
0x1070   :  { %v1459_v14 = vmul.f32 1.442695, %v1452_v12 }
0x1072   :  { %2222 = vpow2.f32 %v1459_v14 }
0x1074   :  { %v2217_v15 = vpop.eup %2216 }
0x1075   :  { %v1470_v19 = vrot.slane %v2217_v15, %v3144_v28 }
0x1076   :  { %v2219_v16 = vpop.eup %2218 }
0x1077   :  { %v1474_v20 = vrot.slane %v2219_v16, %v3144_v28 }
0x1078   :  { %v2221_v22 = vpop.eup %2220 }
0x1079   :  { %v1484_v21 = vsel %vm1483_vm4, %v1474_v20, %v1470_v19  ;;  %v1478_v25 = vrot.slane %v2221_v22, %v3144_v28 }
0x107a   :  { %v1489_v23 = vsel %vm1488_vm5, %v1484_v21, 0.0 }
0x107b   :  { %1490 = vadd.xlane.f32.xlu1 %v1489_v23 }
0x107c   :  { %v2223_v3 = vpop.eup %2222 }
0x107d   :  { %v1482_v26 = vrot.slane %v2223_v3, %v3144_v28 }
0x107f   :  { %v1485_v27 = vsel %vm1483_vm4, %v1482_v26, %v1478_v25 }
0x1080   :  { %v1492_v29 = vsel %vm1488_vm5, %v1485_v27, 0.0 }
0x1081   :  { %1493 = vadd.xlane.f32.xlu0 %v1492_v29 }
0x1108   :  { %v1491_v31 = vpop.xlane.xlu1 %1490 }
0x1109   :  { %2224 = vrcp.f32 %v1491_v31 }
0x110e   :  { %v1494_v32 = vpop.xlane.xlu0 %1493 }
0x110f   :  { %2226 = vrcp.f32 %v1494_v32 }
0x1113   :  { %v2225_v34 = vpop.eup %2224 }
0x1114   :  { %v1502_v35 = vrot.slane %v2225_v34, %v3104_v57  ;;  %v1506_v37 = vrot.slane %v2225_v34, %v1505_v33 }
0x1116   :  { %v1519_v38 = vmul.f32 %v2217_v15, %v1502_v35  ;;  %v1520_v39 = vmul.f32 %v2219_v16, %v1506_v37 }
0x1118   :  { %v1523_v40 = vpack.c.bf16 %v1519_v38, %v1519_v38  ;;  %v1524_v41 = vpack.c.bf16 %v1520_v39, %v1520_v39 }
0x1119   :  { %v2227_v36 = vpop.eup %2226 }
0x111a   :  { %v1531_v42 = vunpack.c.l.b16 %v1523_v40  ;;  %v1532_v6 = vunpack.c.l.b16 %v1524_v41  ;;  %v1510_v8 = vrot.slane %v2227_v36, %v3104_v57  ;;  %v1514_v46 = vrot.slane %v2227_v36, %v1505_v33 }
0x111b   :  { %v1528_v57 = vpack.c.bf16 %v3113_v2, %v3113_v2 }
0x111c   :  { %1534 = vperm.xlu1 %2127, %v1531_v42   ;;  %1537 = vperm.xlu0 %2128, %v1532_v6   ;;  %v1521_v43 = vmul.f32 %v2221_v22, %v1510_v8  ;;  %v1522_v44 = vmul.f32 %v2223_v3, %v1514_v46 }
0x111d   :  { %v1621_v48 = vsel %vm1553_vm6, %v1528_v57, 0 }
0x111e   :  { %v1525_v45 = vpack.c.bf16 %v1521_v43, %v1521_v43  ;;  %v1526_v51 = vpack.c.bf16 %v1522_v44, %v1522_v44  ;;  %2079 = vmatpush3.bf16.msra.mxu0 %v1621_v48 }
0x111f   :  { %2092 = vmatprep.subr.bf16.mxu0 %v2594_v0 }
0x1120   :  { %v1599_v49 = vunpack.c.l.b16 %v1525_v45  ;;  %v1600_v52 = vunpack.c.l.b16 %v1526_v51 }
0x1122   :  { %1602 = vperm.xlu1 %2127, %v1599_v49  }
0x1126   :  { %1605 = vperm.xlu1 %2127, %v1600_v52  }
0x112a   :  { %1154 = vrot.lane.b32.xlu1 %v1153_v1, %s3278_s29 }
0x112e   :  { %1172 = vrot.lane.b32.xlu1 %v3101_v56, %s3278_s29 }
0x1132   :  { %1167 = vrot.lane.b32.xlu1 %v1166_v53, %s2599_s5 }
0x1136   :  { %1178 = vrot.lane.b32.xlu1 %v3090_v47, %s2599_s5 }
0x119b   :  { %v1535_v2 = vpop.permute.xlu1 %1534  ;;  %v1538_v54 = vpop.permute.xlu0 %1537 }
0x119c   :  { %v1542_v55 = vrot.slane %v1535_v2, %v3144_v28  ;;  %v1546_v50 = vrot.slane %v1538_v54, %v3144_v28 }
0x119e   :  { %v1547_v24 = vsel %vm1483_vm4, %v1546_v50, %v1542_v55 }
0x119f   :  { %v1548_v59 = vpack.c.b16 %v1547_v24, %v1547_v24 }
0x11a1   :  { %v1603_v60 = vpop.permute.xlu1 %1602  ;;  %2075 = vmatmul.mubr.msk.bf16.vlgmr.msra.gmra.mrb[28].mxu1 %vm1549_vm7, %v1548_v59 }
0x11a2   :  { %2085 = vmatpush3.bf16.msra.mxu1 %v2140_v58  ;;  %2088 = vmatprep.mubr.msk.bf16.mxu1 %vm2596_vm0, %v2594_v0  ;;  %v1610_v56 = vrot.slane %v1603_v60, %v3144_v28 }
0x11a3   :  { %2086 = vmatprep.subr.bf16.mxu1 %v2594_v0 }
0x11a5   :  { %v1606_v47 = vpop.permute.xlu1 %1605 }
0x11a6   :  { %v1614_v61 = vrot.slane %v1606_v47, %v3144_v28  ;;  %2087 = vmatpush3.bf16.msra.mxu1 %v2141_v18 }
0x11a8   :  { %v1615_v63 = vsel %vm1483_vm4, %v1614_v61, %v1610_v56 }
0x11a9   :  { %v1616_v4 = vpack.c.b16 %v1615_v63, %v1615_v63  ;;  %v1155_v7 = vpop.permute.xlu1 %1154  ;;  %2089 = vmatmul.mubr.msk.bf16.vlgmr.msra.gmra.mrb[32].mxu1 %vm364_vm2, %v3125_v17  ;;  %v2143_v17 = vld [vmem:[%s3244_s9 + $0x8] sm:$0xff]   ;;  %s2600_s9 = smov [#allocation23]  }
0x11aa   :  { %1158 = vst.msk [vmem:[#allocation23] sm:$0x3] %vm1157_vm8, %v1155_v7  ;;  %s1814_s10 = sshll.u32 %s2600_s9, 4  ;;  %s1815_s10 = int_to_ptr.vmem [resolvable:$true] %s1814_s10 }
0x11ab   :  { %2081 = vmatmul.mubr.msk.bf16.vlgmr.msra.gmra.mrb[32].mxu0 %vm1549_vm7, %v1616_v4  ;;  %s2492_s23 = scalar_lea.vmem %s1815_s10, 64  ;;  %p2497_p13 = scmp.lt.s32.totalorder %s1815_s10, %s1815_s10 }
0x11ac   :  { %2096 = vmatprep.mubr.msk.bf16.mxu0 %vm2596_vm0, %v2594_v0  ;;  %2093 = vmatpush3.bf16.msra.mxu0 %v2142_v13  ;;  %p2493_p12 = scmp.ne.s32.totalorder %s1815_s10, %s2492_s23  ;;  %p2498_p0 = scmp.lt.s32.totalorder %s2492_s23, %s2492_s23 }
0x11ad   :  { %v1173_v10 = vpop.permute.xlu1 %1172  ;;  %2094 = vmatprep.subr.bf16.mxu0 %v2594_v0 }
0x11ae   :  { %1176 = vst.msk [vmem:[#allocation23 + $0x2] sm:$0x3] %vm1157_vm8, %v1173_v10  ;;  %p2499_p1 = por %p2498_p0, %p2497_p13 }
0x11b0   :  { %2095 = vmatpush3.bf16.msra.mxu0 %v2143_v17  ;;  %p2500_p2 = pnand %p2499_p1, %p2493_p12 }
0x11b1   :  { %v1168_v11 = vpop.permute.xlu1 %1167 }
0x11b2   :  { %1170 = vst.msk [vmem:[#allocation25] sm:$0x3] %vm1157_vm8, %v1168_v11 }
0x11b5   :  { %v1179_v12 = vpop.permute.xlu1 %1178 }
0x11b6   :  { %1182 = vst.msk [vmem:[#allocation25 + $0x2] sm:$0x3] %vm1157_vm8, %v1179_v12 }
0x1274   :  { %v1591_v14 = vpop.f32.mrb[28].mxu1 }
0x1275   :  { %v2076_v28 = vpop.f32.mrb[29].mxu1 }
0x1276   :  { %v1594_v15 = vpop.f32.mrb[30].mxu1 }
0x1277   :  { %v2077_v16 = vpop.f32.mrb[31].mxu1 }
0x127c   :  { %v1729_v19 = vpop.f32.mrb[32].mxu1 }
0x127d   :  { %v2090_v20 = vpop.f32.mrb[33].mxu1 }
0x127e   :  { %v1657_v21 = vpop.f32.mrb[32].mxu0  ;;  %v1732_v22 = vpop.f32.mrb[34].mxu1 }
0x127f   :  { %v1665_v23 = vcombine.low %v1591_v14, %v1657_v21  ;;  %v2082_v3 = vpop.f32.mrb[33].mxu0  ;;  %v2091_v25 = vpop.f32.mrb[35].mxu1 }
0x1280   :  { %v1660_v26 = vpop.f32.mrb[34].mxu0 }
0x1281   :  { %v1672_v27 = vrot.slane %v1665_v23, %v2904_v9  ;;  %v2083_v0 = vpop.f32.mrb[35].mxu0 }
0x1283   :  { %v1674_v29 = vpack.c.bf16 %v1672_v27, %v1672_v27 }
0x1285   :  { %2097 = vmatmul.mubr.msk.bf16.vlgmr.msra.gmra.mrb[36].mxu0 %vm364_vm2, %v1674_v29 }
0x1286   :  { %2503 = shalt.err (!%p2500_p2)
}
0x1287   :  { %s2504_s25 = scalar_lea.hbm %s3254_s19, 64 }
0x1288   :  { %p2505_p3 = scmp.ne.s32.totalorder %s3254_s19, %s2504_s25  ;;  %p2508_p4 = scmp.lt.u32.totalorder %s2504_s25, %s3254_s19 }
0x128a   :  { %p2510_p5 = pnand %p2508_p4, %p2505_p3 }
0x128c   :  { %2513 = shalt.err (!%p2510_p5)
}
0x128d   :  { %1820 = dma.vmem_to_hbm [thread:$0]  %s1815_s10, 64, %s3254_s19, [#allocation24], %s3278_s29, %s3278_s29, %s3277_s0  }
0x128e   :  { %s2601_s13 = smov [#allocation25]  }
0x128f   :  { %s1826_s22 = sshll.u32 %s2601_s13, 4  ;;  %s1827_s22 = int_to_ptr.vmem [resolvable:$true] %s1826_s22 }
0x1290   :  { %s2514_s14 = scalar_lea.vmem %s1827_s22, 64  ;;  %p2519_p7 = scmp.lt.s32.totalorder %s1827_s22, %s1827_s22 }
0x1291   :  { %p2515_p6 = scmp.ne.s32.totalorder %s1827_s22, %s2514_s14  ;;  %p2520_p8 = scmp.lt.s32.totalorder %s2514_s14, %s2514_s14 }
0x1293   :  { %p2521_p9 = por %p2520_p8, %p2519_p7 }
0x1295   :  { %p2522_p10 = pnand %p2521_p9, %p2515_p6 }
0x1297   :  { %2525 = shalt.err (!%p2522_p10)
}
0x1298   :  { %s2526_s11 = scalar_lea.hbm %s3255_s20, 64 }
0x1299   :  { %p2527_p11 = scmp.ne.s32.totalorder %s3255_s20, %s2526_s11  ;;  %p2530_p12 = scmp.lt.u32.totalorder %s2526_s11, %s3255_s20 }
0x129b   :  { %p2532_p13 = pnand %p2530_p12, %p2527_p11 }
0x129d   :  { %2535 = shalt.err (!%p2532_p13)
}
0x129e   :  { %1832 = dma.vmem_to_hbm [thread:$0]  %s1827_s22, 64, %s3255_s20, [#allocation24], %s3278_s29, %s3278_s29, %s3277_s0   ;;  %v1899_v30 = vld [vmem:[#allocation16] ss:$0 sm:$0xff] }
0x129f   :  { %s2602_s28 = smov [#allocation22]  }
0x12a0   :  { %s1805_s8 = sshll.u32 %s2602_s28, 4  ;;  %s1806_s8 = int_to_ptr.vmem [resolvable:$true] %s1805_s8 }
0x12a1   :  { %s2536_s21 = scalar_lea.vmem %s1806_s8, 64  ;;  %p2541_p1 = scmp.lt.s32.totalorder %s1806_s8, %s1806_s8 }
0x12a2   :  { %p2537_p0 = scmp.ne.s32.totalorder %s1806_s8, %s2536_s21  ;;  %p2542_p2 = scmp.lt.s32.totalorder %s2536_s21, %s2536_s21 }
0x12a4   :  { %p2543_p3 = por %p2542_p2, %p2541_p1 }
0x12a6   :  { %p2544_p4 = pnand %p2543_p3, %p2537_p0 }
0x1358   :  { %v1784_v9 = vpop.f32.mrb[36].mxu0 }
0x1359   :  { %v1785_v31 = vadd.f32 %v1784_v9, %v1729_v19  ;;  %v2098_v32 = vpop.f32.mrb[37].mxu0 }
0x135a   :  { %v1787_v33 = vpop.f32.mrb[38].mxu0 }
0x135b   :  { %v1797_v34 = vadd.f32 %v1899_v30, %v1785_v31  ;;  %v2099_v35 = vpop.f32.mrb[39].mxu0 }
0x135d   :  { %1798 = vst [vmem:[#allocation22] sm:$0xf] %v1797_v34 }
0x135e   :  { %2547 = shalt.err (!%p2544_p4)
}
0x135f   :  { %s3282_s0 = sld [smem:[#allocation40_spill]] }
0x1365   :  { %s2548_s29 = scalar_lea.hbm %s3282_s0, 64 }
0x1366   :  { %p2549_p5 = scmp.ne.s32.totalorder %s3282_s0, %s2548_s29  ;;  %p2552_p6 = scmp.lt.u32.totalorder %s2548_s29, %s3282_s0 }
0x1368   :  { %p2554_p7 = pnand %p2552_p6, %p2549_p5 }
0x136a   :  { %2557 = shalt.err (!%p2554_p7)
}
0x136b   :  { %1808 = dma.vmem_to_hbm [thread:$0]  %s1806_s8, 64, %s3282_s0, [#allocation4]  }
0x136c   :  { %2572 = dma.done.wait [#allocation4], 64  }
0x136d   :  { %2573 = vsyncadd [#allocation4], 4294967232 }
0x136e   :  { %2574 = dma.done.wait [#allocation24], 128  }
0x136f   :  { %2575 = vsyncadd [#allocation24], 4294967168 }
0x1370   :  { %1842 = vsyncpa [#allocation3], 1 }
0x1371   :  { %1843 = vsyncpa [#allocation6], 1 }
0x1372   :  { %1844 = vsyncpa [#allocation9], 1 }
0x1373   :  { %1845 = vsyncpa [#allocation12], 1 }
0x1374   :  { %1846 = vsyncpa [#allocation15], 1 }
0x1375   :  { %1847 = vsyncpa [#allocation18], 1 }
0x1376   :  { %1848 = vsyncpa [#allocation21], 1 }
0x1377   :  { %1849 = vsyncpa [#allocation4], 1 }
0x1378   :  { %1850 = vsyncpa [#allocation24], 1 }

</bundles_post_ra>
